<compile_context>
chip_gen: v6e
topology: v6e:2x2x1
jax: 0.10.0
libtpu: 0.0.40
codegen_flags: <defaults>
</compile_context>

<pallas_src>
import functools

import jax
import jax.numpy as jnp
from jax.experimental import pallas as pl
from jax.experimental.pallas import tpu as pltpu


def _round_up(x: int, m: int) -> int:
    return ((x + m - 1) // m) * m


def _hloss_math(p, t, f0: float, maxh: float):
    """Shared elementwise math (kernel body and jnp fallback)."""
    gt = p > t
    r_pt = jnp.round(p / t)          # integer-valued on the p >  t branch
    r_tp = jnp.round(t / p)          # integer-valued on the p <= t branch
    h0 = jnp.where(gt, r_pt, 1.0 / r_tp)

    # round(1/h0) without an extra reciprocal + round:
    #  * p <= t: h0 = 1/round(t/p)   -> round(1/h0) == round(t/p) == r_tp.
    #  * p >  t: h0 = round(p/t) >= 1 -> 1/h0 in (0,1]; round-half-even gives
    #    1 iff h0 == 1, 0 otherwise (0.5 rounds to 0).
    inv_h0_round = jnp.where(gt, jnp.where(r_pt == 1.0, 1.0, 0.0), r_tp)

    cond = (inv_h0_round <= maxh) & (h0 <= maxh) & (h0 > 0.0)
    h = jnp.where(cond, h0, 1.0)

    # log2 split saves one f32 divide vs log2(ratio); error ~1e-7 absolute.
    loss = jnp.abs(jnp.log2(p + f0) - jnp.log2(h * t + f0))
    return loss, h, h0


@functools.partial(jax.jit, static_argnames=("f0", "maxh"))
def _hloss_jnp(p, t, *, f0: float, maxh: float):
    return _hloss_math(p, t, f0, maxh)


def _make_kernel(f0: float, maxh: float, with_h: bool):
    # Plain Python floats -> scalar literals (not captured jax.Array consts).
    f0 = float(f0)
    maxh = float(maxh)

    if with_h:
        def kernel(p_ref, t_ref, loss_ref, h_ref, rh_ref):
            loss, h, rh = _hloss_math(p_ref[...], t_ref[...], f0, maxh)
            loss_ref[...] = loss
            h_ref[...] = h        # module's self.h
            rh_ref[...] = rh      # module's self.rh
    else:
        def kernel(p_ref, t_ref, loss_ref):
            loss, _, _ = _hloss_math(p_ref[...], t_ref[...], f0, maxh)
            loss_ref[...] = loss
    return kernel


def elem_exp_hloss(product: jax.Array, target: jax.Array, *,
                   f0: float, maxh: float,
                   return_h: bool = True,
                   max_tile_rows: int = 512, lane_width: int = 1024,
                   min_pallas_elems: int = 16384):
    """Elementwise ElemExpHLoss.

    Returns (loss, h, rh) if return_h else just loss, each same shape as the
    inputs. Accepts arbitrary (matching) input shapes.
    """
    assert product.shape == target.shape, "product/target shapes must match"
    orig_shape = product.shape
    f0 = float(f0)
    maxh = float(maxh)

    p = jnp.asarray(product, jnp.float32)
    t = jnp.asarray(target, jnp.float32)
    n = int(p.size)
    assert n > 0

    # Tiny inputs: pallas_call launch + pad/reshape overhead would dominate;
    # a fused XLA elementwise expression is strictly faster there.
    if n < min_pallas_elems:
        loss, h, rh = _hloss_jnp(p, t, f0=f0, maxh=maxh)
        return (loss, h, rh) if return_h else loss

    # Lane-dense layout: last dim a (large) multiple of 128.
    tile_c = min(lane_width, _round_up(n, 128))
    rows = pl.cdiv(n, tile_c)
    rows_p = _round_up(rows, 8)      # pad rows only to a sublane multiple
    n_pad = rows_p * tile_c
    aligned = (n_pad == n)

    if aligned:
        p2 = p.reshape(rows_p, tile_c)   # pure reshape, no copy
        t2 = t.reshape(rows_p, tile_c)
    else:
        pad = n_pad - n
        ones = jnp.ones((pad,), jnp.float32)     # benign positive padding
        p2 = jnp.concatenate([p.reshape(-1), ones]).reshape(rows_p, tile_c)
        t2 = jnp.concatenate([t.reshape(-1), ones]).reshape(rows_p, tile_c)

    # Ensure the "parallel" grid has >= 2 steps whenever there is enough work
    # (v7x: 2 TensorCores). Partial last blocks are handled by Pallas; the
    # kernel is purely elementwise so overhang reads/writes are harmless.
    tile_r = min(max_tile_rows, max(8, _round_up(pl.cdiv(rows_p, 2), 8)))
    grid = (pl.cdiv(rows_p, tile_r),)

    blk = pl.BlockSpec((tile_r, tile_c), lambda i: (i, 0))
    out_sd = jax.ShapeDtypeStruct((rows_p, tile_c), jnp.float32)
    n_out = 3 if return_h else 1

    outs = pl.pallas_call(
        _make_kernel(f0, maxh, return_h),
        out_shape=(out_sd,) * n_out,
        grid=grid,
        in_specs=[blk, blk],
        out_specs=(blk,) * n_out,
        compiler_params=pltpu.CompilerParams(
            dimension_semantics=("parallel",),
            # 2 in + up to 3 out, double-buffered, <= 2 MiB tiles -> <= ~20 MiB
            # resident; 48 MiB leaves headroom under v7x's 64 MiB physical VMEM
            # and lifts the v5e (16 MiB) / v6e (32 MiB) scoped defaults.
            vmem_limit_bytes=48 * 1024 * 1024),
    )(p2, t2)

    if aligned:
        unpack = lambda x: x.reshape(orig_shape)                  # no copy
    else:
        unpack = lambda x: x.reshape(-1)[:n].reshape(orig_shape)  # slice copy

    if return_h:
        loss2, h2, rh2 = outs
        return unpack(loss2), unpack(h2), unpack(rh2)
    (loss2,) = outs
    return unpack(loss2)


def _reference(product, target, f0, maxh):
    """Pure-JAX reference mirroring the PyTorch scalar logic, vectorized."""
    p = jnp.asarray(product, jnp.float32)
    t = jnp.asarray(target, jnp.float32)
    h0 = jnp.where(p > t, jnp.round(p / t), 1.0 / jnp.round(t / p))
    cond = (jnp.round(1.0 / h0) <= maxh) & (h0 <= maxh) & (h0 > 0.0)
    h = jnp.where(cond, h0, 1.0)
    loss = jnp.abs(jnp.log2((p + f0) / (h * t + f0)))
    return loss, h, h0


if __name__ == "__main__":
    # Deterministic config (stands in for DictConfig: cfg.maxh, cfg.base_freq)
    MAXH = 8.0
    F0 = 0.025

    key = jax.random.PRNGKey(0)

    # 1) Main Pallas-path check: 32 x 1024 elementwise pairs -> aligned
    #    no-copy slab, 2-step parallel grid.
    kp, kt = jax.random.split(key)
    shape = (32, 1024)
    product = jax.random.uniform(kp, shape, jnp.float32, minval=0.25, maxval=8.0)
    target = jax.random.uniform(kt, shape, jnp.float32, minval=0.25, maxval=8.0)

    loss, h, rh = elem_exp_hloss(product, target, f0=F0, maxh=MAXH)
    jax.block_until_ready((loss, h, rh))
    ref_loss, ref_h, ref_rh = _reference(product, target, F0, MAXH)
    assert loss.shape == shape and h.shape == shape and rh.shape == shape
    assert jnp.allclose(loss, ref_loss, atol=1e-5, rtol=1e-5)
    assert jnp.allclose(h, ref_h)
    assert jnp.allclose(rh, ref_rh)

    # Loss-only variant (drops h/rh HBM writes).
    loss_only = elem_exp_hloss(product, target, f0=F0, maxh=MAXH, return_h=False)
    jax.block_until_ready(loss_only)
    assert jnp.allclose(loss_only, ref_loss, atol=1e-5, rtol=1e-5)

    # 2) Small ragged shape: padded Pallas path (forced) and jnp fallback.
    shape2 = (6, 300)
    kp2, kt2 = jax.random.split(jax.random.PRNGKey(1))
    p_s = jax.random.uniform(kp2, shape2, jnp.float32, minval=0.25, maxval=8.0)
    t_s = jax.random.uniform(kt2, shape2, jnp.float32, minval=0.25, maxval=8.0)
    rl2, rh2, rr2 = _reference(p_s, t_s, F0, MAXH)
    for kwargs in (dict(min_pallas_elems=0), dict()):   # pallas path / fallback
        l2, h2, r2 = elem_exp_hloss(p_s, t_s, f0=F0, maxh=MAXH, **kwargs)
        jax.block_until_ready((l2, h2, r2))
        assert l2.shape == shape2 and h2.shape == shape2 and r2.shape == shape2
        assert jnp.allclose(l2, rl2, atol=1e-5, rtol=1e-5)
        assert jnp.allclose(h2, rh2)
        assert jnp.allclose(r2, rr2)

    # 3) Boundary cases: exact half-way ratios (round-half-even) and extreme
    #    ratios (locks the in-kernel round(1/h0) rewrite + h0 > 0 guard).
    pb = jnp.array([2.5, 3.5, 1.0, 1.0, 1.0, 1e-30, 1e30, 1.0, 2.0, 7.999],
                   jnp.float32)
    tb = jnp.array([1.0, 1.0, 2.5, 1.5, 1.0, 1.0, 1.0, 1e30, 1.0, 1.0],
                   jnp.float32)
    rlb, rhb, rrb = _reference(pb, tb, F0, MAXH)
    lb, hb, rb = elem_exp_hloss(pb, tb, f0=F0, maxh=MAXH, min_pallas_elems=0)
    jax.block_until_ready((lb, hb, rb))
    assert jnp.allclose(lb, rlb, atol=1e-5, rtol=1e-5)
    assert jnp.allclose(hb, rhb)
    assert jnp.allclose(rb, rrb)

    print("KERNEL_OK")
</pallas_src>

<mosaic_0001>
module attributes {stable_mosaic.version = 11 : i64} {
  func.func @kernel(%arg0: i32, %arg1: memref<16x1024xf32, #tpu.memory_space<vmem>>, %arg2: memref<16x1024xf32, #tpu.memory_space<vmem>>, %arg3: memref<16x1024xf32, #tpu.memory_space<vmem>>, %arg4: memref<16x1024xf32, #tpu.memory_space<vmem>>, %arg5: memref<16x1024xf32, #tpu.memory_space<vmem>>) attributes {dimension_semantics = [#tpu.dimension_semantics<parallel>], iteration_bounds = array<i64: 2>, scalar_prefetch = 0 : i64, scratch_operands = 0 : i64, tpu.core_type = #tpu.core_type<tc>, window_params = [{transform_indices = @transform_0, window_bounds = array<i64: 16, 1024>}, {transform_indices = @transform_1, window_bounds = array<i64: 16, 1024>}, {transform_indices = @transform_2, window_bounds = array<i64: 16, 1024>}, {transform_indices = @transform_3, window_bounds = array<i64: 16, 1024>}, {transform_indices = @transform_4, window_bounds = array<i64: 16, 1024>}]} {
    %c0 = arith.constant 0 : index
    %c0_0 = arith.constant 0 : index
    %0 = vector.load %arg1[%c0, %c0_0] : memref<16x1024xf32, #tpu.memory_space<vmem>>, vector<16x1024xf32>
    %c0_1 = arith.constant 0 : index
    %c0_2 = arith.constant 0 : index
    %1 = vector.load %arg2[%c0_1, %c0_2] : memref<16x1024xf32, #tpu.memory_space<vmem>>, vector<16x1024xf32>
    %2 = arith.cmpf ogt, %0, %1 : vector<16x1024xf32>
    %3 = arith.divf %0, %1 : vector<16x1024xf32>
    %4 = math.roundeven %3 : vector<16x1024xf32>
    %5 = arith.divf %1, %0 : vector<16x1024xf32>
    %6 = math.roundeven %5 : vector<16x1024xf32>
    %cst = arith.constant 1.000000e+00 : f32
    %7 = vector.broadcast %cst : f32 to vector<16x1024xf32>
    %8 = arith.divf %7, %6 : vector<16x1024xf32>
    %9 = arith.select %2, %4, %8 : vector<16x1024xi1>, vector<16x1024xf32>
    %cst_3 = arith.constant 1.000000e+00 : f32
    %10 = vector.broadcast %cst_3 : f32 to vector<16x1024xf32>
    %11 = arith.cmpf oeq, %4, %10 : vector<16x1024xf32>
    %cst_4 = arith.constant 1.000000e+00 : f32
    %cst_5 = arith.constant 0.000000e+00 : f32
    %12 = vector.broadcast %cst_4 : f32 to vector<16x1024xf32>
    %13 = vector.broadcast %cst_5 : f32 to vector<16x1024xf32>
    %14 = arith.select %11, %12, %13 : vector<16x1024xi1>, vector<16x1024xf32>
    %15 = arith.select %2, %14, %6 : vector<16x1024xi1>, vector<16x1024xf32>
    %cst_6 = arith.constant 8.000000e+00 : f32
    %16 = vector.broadcast %cst_6 : f32 to vector<16x1024xf32>
    %17 = arith.cmpf ole, %15, %16 : vector<16x1024xf32>
    %cst_7 = arith.constant 8.000000e+00 : f32
    %18 = vector.broadcast %cst_7 : f32 to vector<16x1024xf32>
    %19 = arith.cmpf ole, %9, %18 : vector<16x1024xf32>
    %20 = arith.andi %17, %19 : vector<16x1024xi1>
    %cst_8 = arith.constant 0.000000e+00 : f32
    %21 = vector.broadcast %cst_8 : f32 to vector<16x1024xf32>
    %22 = arith.cmpf ogt, %9, %21 : vector<16x1024xf32>
    %23 = arith.andi %20, %22 : vector<16x1024xi1>
    %cst_9 = arith.constant 1.000000e+00 : f32
    %24 = vector.broadcast %cst_9 : f32 to vector<16x1024xf32>
    %25 = arith.select %23, %9, %24 : vector<16x1024xi1>, vector<16x1024xf32>
    %cst_10 = arith.constant 2.500000e-02 : f32
    %26 = vector.broadcast %cst_10 : f32 to vector<16x1024xf32>
    %27 = arith.addf %0, %26 : vector<16x1024xf32>
    %28 = math.log %27 : vector<16x1024xf32>
    %cst_11 = arith.constant 2.000000e+00 : f32
    %29 = math.log %cst_11 : f32
    %30 = vector.broadcast %29 : f32 to vector<16x1024xf32>
    %31 = arith.divf %28, %30 : vector<16x1024xf32>
    %32 = arith.mulf %25, %1 : vector<16x1024xf32>
    %cst_12 = arith.constant 2.500000e-02 : f32
    %33 = vector.broadcast %cst_12 : f32 to vector<16x1024xf32>
    %34 = arith.addf %32, %33 : vector<16x1024xf32>
    %35 = math.log %34 : vector<16x1024xf32>
    %cst_13 = arith.constant 2.000000e+00 : f32
    %36 = math.log %cst_13 : f32
    %37 = vector.broadcast %36 : f32 to vector<16x1024xf32>
    %38 = arith.divf %35, %37 : vector<16x1024xf32>
    %39 = arith.subf %31, %38 : vector<16x1024xf32>
    %40 = math.absf %39 : vector<16x1024xf32>
    %c0_14 = arith.constant 0 : index
    %c0_15 = arith.constant 0 : index
    %41 = vector.load %arg3[%c0_14, %c0_15] : memref<16x1024xf32, #tpu.memory_space<vmem>>, vector<16x1024xf32>
    tpu.vector_store %arg3[%c0_14, %c0_15], %40 {strides = array<i32>} : memref<16x1024xf32, #tpu.memory_space<vmem>>, vector<16x1024xf32>,
    %c0_16 = arith.constant 0 : index
    %c0_17 = arith.constant 0 : index
    %42 = vector.load %arg4[%c0_16, %c0_17] : memref<16x1024xf32, #tpu.memory_space<vmem>>, vector<16x1024xf32>
    tpu.vector_store %arg4[%c0_16, %c0_17], %25 {strides = array<i32>} : memref<16x1024xf32, #tpu.memory_space<vmem>>, vector<16x1024xf32>,
    %c0_18 = arith.constant 0 : index
    %c0_19 = arith.constant 0 : index
    %43 = vector.load %arg5[%c0_18, %c0_19] : memref<16x1024xf32, #tpu.memory_space<vmem>>, vector<16x1024xf32>
    tpu.vector_store %arg5[%c0_18, %c0_19], %9 {strides = array<i32>} : memref<16x1024xf32, #tpu.memory_space<vmem>>, vector<16x1024xf32>,
    return
  }
  func.func @transform_0(%arg0: i32) -> (i32, i32) {
    %c0_i32 = arith.constant 0 : i32
    %c0_i32_0 = arith.constant 0 : i32
    return %arg0, %c0_i32 : i32, i32
  }
  func.func @transform_1(%arg0: i32) -> (i32, i32) {
    %c0_i32 = arith.constant 0 : i32
    %c0_i32_0 = arith.constant 0 : i32
    return %arg0, %c0_i32 : i32, i32
  }
  func.func @transform_2(%arg0: i32) -> (i32, i32) {
    %c0_i32 = arith.constant 0 : i32
    %c0_i32_0 = arith.constant 0 : i32
    return %arg0, %c0_i32 : i32, i32
  }
  func.func @transform_3(%arg0: i32) -> (i32, i32) {
    %c0_i32 = arith.constant 0 : i32
    %c0_i32_0 = arith.constant 0 : i32
    return %arg0, %c0_i32 : i32, i32
  }
  func.func @transform_4(%arg0: i32) -> (i32, i32) {
    %c0_i32 = arith.constant 0 : i32
    %c0_i32_0 = arith.constant 0 : i32
    return %arg0, %c0_i32 : i32, i32
  }
}

</mosaic_0001>

<bundles_post_ra>
// kernel: tpu_custom_call.1
= control target key start
LH: loop header
LB: loop body
LE: loop exit
PB: predicated region body
PF: predicated region fallthrough
CT: control target
= control target key end

     0   :  { %10 = vsyncpa [#allocation3], 0  ;;  %s2978_s0 = inlined_call_operand.hbm [shape: f32[32,1024], index: 0, kind: input, shape index: {}]   ;;  %s2979_s1 = inlined_call_operand.hbm [shape: f32[32,1024], index: 1, kind: input, shape index: {}]   ;;  %s2980_s2 = inlined_call_operand.hbm [shape: f32[32,1024], index: 2, kind: output, shape index: {0}]   ;;  %s2981_s3 = inlined_call_operand.hbm [shape: f32[32,1024], index: 3, kind: output, shape index: {1}]   ;;  %s2982_s4 = inlined_call_operand.hbm [shape: f32[32,1024], index: 4, kind: output, shape index: {2}]  }
   0x1   :  { %12 = vsyncpa [#allocation3 + $0x1], 0 }
   0x2   :  { %13 = vsyncpa [#allocation6], 0 }
   0x3   :  { %15 = vsyncpa [#allocation6 + $0x1], 0 }
   0x4   :  { %16 = vsyncpa [#allocation4], 0 }
   0x5   :  { %18 = vsyncpa [#allocation4 + $0x1], 0 }
   0x6   :  { %19 = vsyncpa [#allocation9], 0 }
   0x7   :  { %21 = vsyncpa [#allocation9 + $0x1], 0  ;;  %s1799_s15 = smov 0   ;;  %s1801_s16 = smov 0  }
   0x8   :  { %s1803_s17 = smov 0   ;;  %s1805_s18 = smov 0  }
   0x9 LB: > { %s1820_s19 = sadd.s32 4294967295, %s1762_s18   ;;  %s2984_s20 = sadd.s32 4294967294, %s1762_s18   ;;  %s1762_s18 = sphi %s1805_s18, %s3052_s18   ;;  %s1758_s17 = sphi %s1803_s17, %s3051_s17   ;;  %s1754_s16 = sphi %s1801_s16, %s3050_s16   ;;  %s1750_s15 = sphi %s1799_s15, %s3049_s15  }
   0xa   : > { %s1824_s21 = sadd.s32 1, %s1762_s18   ;;  %s34_s22 = sadd.s32 1, %s1758_s17 }
   0xb   : > { %s31_s23 = ssub.s32 %s1762_s18, %s1824_s21  ;;  %p41_p0 = scmp.ne.s32.totalorder %s1758_s17, %s1754_s16 }
   0xc   : > { %p32_p1 = scmp.eq.s32.totalorder %s31_s23, 0  ;;  %p42_p2 = scmp.eq.s32.totalorder %s1762_s18, 0 }
   0xd   : > { %p47_p3 = scmp.ne.s32.totalorder %s1754_s16, %s1750_s15  ;;  %p48_p4 = scmp.eq.s32.totalorder %s1820_s19, 0 }
   0xe   : > { %s1836_s24 = scalar_select %p32_p1, %s1758_s17, %s34_s22  }
   0xf   : > { %p1838_p5 = por %p42_p2, %p41_p0  ;;  %p1842_p6 = por %p48_p4, %p47_p3 }
  0x10   : > { %p97_p7 = scmp.eq.s32.totalorder %s1820_s19, 1  ;;  %p103_p8 = scmp.eq.s32.totalorder %s2984_s20, 1 }
  0x11   : > { %s2987_s26 = scalar_select %p1842_p6, 1, 0 }
  0x12   : > { %p1382_p10 = scmp.lt.s32.totalorder %s1762_s18, 2  ;;  %p1851_p11 = por %p97_p7, %p41_p0 }
  0x13   : > { %p1855_p12 = por %p103_p8, %p47_p3  ;;  %s1860_s29 = sand.u32 1, %s1758_s17  }
  0x14   : > { %s2988_s27 = scalar_select %p1851_p11, 1, 0 }
  0x15   : > { %s2989_s28 = scalar_select %p1855_p12, 1, 0 }
  0x16   : > { %s1090_s30 = sshll.u32 %s1762_s18, 11  ;;  %s1061_s5 = sshll.u32 %s1860_s29, 7 }
  0x17   : > { %s1869_s8 = scalar_lea.hbm %s2978_s0, %s1090_s30  ;;  %s179_s9 = scalar_lea.vmem [#allocation2], %s1061_s5 }
  0x18   : > { %s187_s10 = sshll.u32 %s179_s9, 4  ;;  %p1875_p13 = pnand %p1382_p10, %p1838_p5  ;;  %s1879_s10 = int_to_ptr.vmem [resolvable:$true] %s187_s10 }
  0x19   : > { %s176_s12 = scalar_lea.sflag [#allocation3], %s1860_s29  ;;  %s1582_s13 = scalar_lea.hbm %s1869_s8, 2048 }
  0x1a   : > { %p1583_p0 = scmp.ne.s32.totalorder %s1869_s8, %s1582_s13  ;;  %p1584_p1 = pneg %p1875_p13 }
  0x1b   : > { %s1587_s23 = scalar_lea.hbm %s2978_s0, 4096  ;;  %p1588_p4 = scmp.lt.s32.totalorder %s1869_s8, %s2978_s0 }
  0x1c   : > { %p1585_p2 = pnand %p1584_p1, %p1583_p0  ;;  %p1589_p5 = scmp.lt.s32.totalorder %s1587_s23, %s1582_s13 }
  0x1e   : > { %p1586_p3 = pneg %p1585_p2  ;;  %p1590_p7 = por %p1589_p5, %p1588_p4 }
  0x20   : > { %p1591_p8 = pnand %p1590_p7, %p1586_p3 }
  0x22   : > { %1594 = shalt.err (!%p1591_p8)
}
  0x23   : > { %s1595_s7 = scalar_lea.vmem %s1879_s10, 2048  ;;  %s1764_s9 = smov [#allocation2]  }
  0x24   : > { %p1596_p10 = scmp.ne.s32.totalorder %s1879_s10, %s1595_s7  ;;  %s1600_s14 = sshll.u32 %s1764_s9, 4  ;;  %s1601_s14 = int_to_ptr.vmem [resolvable:$false] %s1600_s14 }
  0x25   : > { %s1602_s22 = scalar_lea.vmem %s1601_s14, 4096  ;;  %p1603_p9 = scmp.lt.s32.totalorder %s1879_s10, %s1601_s14 }
  0x26   : > { %p1598_p0 = pnand %p1596_p10, %p1584_p1  ;;  %p1604_p12 = scmp.lt.s32.totalorder %s1602_s22, %s1595_s7 }
  0x28   : > { %p1599_p2 = pneg %p1598_p0  ;;  %p1605_p11 = por %p1604_p12, %p1603_p9 }
  0x2a   : > { %p1606_p4 = pnand %p1605_p11, %p1599_p2 }
  0x2c   : > { %1609 = shalt.err (!%p1606_p4)
}
  0x2d   : > { %s1765_s13 = smov 1024   ;;  %s1766_s23 = smov 64  }
  0x2e   : > { %1368 = dma.hbm_to_vmem [thread:$0]  (!%p1875_p13), %s1869_s8, 2048, %s1879_s10, %s176_s12, %s1765_s13, %s1765_s13, %s1766_s23  }
  0x2f   : > { %p1069_p9 = scmp.ge.s32.totalorder %s1762_s18, 1  ;;  %p217_p11 = scmp.lt.s32.totalorder %s1762_s18, 3 }
  0x30   : > { %s1922_s9 = scalar_lea.hbm %s2979_s1, %s1090_s30  ;;  %s201_s14 = scalar_lea.vmem [#allocation5], %s1061_s5 }
  0x31   : > { %p1913_p12 = pnand %p1069_p9, %p217_p11  ;;  %s209_s22 = sshll.u32 %s201_s14, 4  ;;  %s1926_s22 = int_to_ptr.vmem [resolvable:$true] %s209_s22 }
  0x32   : > { %s198_s8 = scalar_lea.sflag [#allocation6], %s1860_s29  ;;  %s1610_s10 = scalar_lea.hbm %s1922_s9, 2048 }
  0x33   : > { %p1611_p3 = scmp.ne.s32.totalorder %s1922_s9, %s1610_s10  ;;  %s1615_s30 = scalar_lea.hbm %s2979_s1, 4096 }
  0x34   : > { %p1616_p8 = scmp.lt.s32.totalorder %s1922_s9, %s2979_s1  ;;  %p1617_p10 = scmp.lt.s32.totalorder %s1615_s30, %s1610_s10 }
  0x35   : > { %p1613_p5 = pnand %p1611_p3, %p1584_p1 }
  0x36   : > { %p1618_p0 = por %p1617_p10, %p1616_p8 }
  0x37   : > { %p1614_p7 = pneg %p1613_p5 }
  0x39   : > { %p1619_p2 = pnand %p1618_p0, %p1614_p7 }
  0x3b   : > { %1622 = shalt.err (!%p1619_p2)
}
  0x3c   : > { %s1623_s29 = scalar_lea.vmem %s1926_s22, 2048  ;;  %s1767_s20 = smov [#allocation5]  }
  0x3d   : > { %p1624_p4 = scmp.ne.s32.totalorder %s1926_s22, %s1623_s29  ;;  %s1628_s5 = sshll.u32 %s1767_s20, 4  ;;  %s1629_s5 = int_to_ptr.vmem [resolvable:$false] %s1628_s5 }
  0x3e   : > { %s1630_s14 = scalar_lea.vmem %s1629_s5, 4096  ;;  %p1631_p3 = scmp.lt.s32.totalorder %s1926_s22, %s1629_s5 }
  0x3f   : > { %p1626_p9 = pnand %p1624_p4, %p1584_p1  ;;  %p1632_p5 = scmp.lt.s32.totalorder %s1630_s14, %s1623_s29 }
  0x41   : > { %p1627_p11 = pneg %p1626_p9  ;;  %p1633_p6 = por %p1632_p5, %p1631_p3 }
  0x43   : > { %p1634_p8 = pnand %p1633_p6, %p1627_p11 }
  0x45   : > { %1637 = shalt.err (!%p1634_p8)
}
  0x46   : > { %1371 = dma.hbm_to_vmem [thread:$0]  (!%p1875_p13), %s1922_s9, 2048, %s1926_s22, %s198_s8, %s1765_s13, %s1765_s13, %s1766_s23  }
  0x47   : > { %221 = sbr.rel (%p1913_p12) target bundleno = 323 (0x143), region = 28  ;;  %s1957_s10 = sand.u32 (!%p1913_p12), 1, %s1754_s16  }
  0x48   : > { %s1960_s12 = sshll.u32 (!%p1913_p12), %s1957_s10, 7  ;;  %s224_s30 = scalar_lea.sflag (!%p1913_p12), [#allocation3], %s1957_s10 }
  0x49   : > { %s1964_s11 = scalar_lea.vmem (!%p1913_p12), [#allocation2], %s1960_s12  ;;  %p2992_p6 = scmp.ne.s32.totalorder (!%p1913_p12), %s2987_s26, 0 }
  0x4c   : > { %1733 = dma.done.wait (%p2992_p6), %s224_s30, 2048  }
  0x4d   : > { %1735 = vsyncadd (%p2992_p6), %s224_s30, 4294965248  ;;  %s233_s13 = scalar_lea.sflag [#allocation6], %s1957_s10  ;;  %s1972_s23 = scalar_lea.vmem [#allocation5], %s1960_s12 }
  0x4e   : > { %1737 = dma.done.wait (%p2992_p6), %s233_s13, 2048  }
  0x4f   : > { %1739 = vsyncadd (%p2992_p6), %s233_s13, 4294965248  ;;  %v1979_v0 = vld [vmem:[%s1964_s11] sm:$0xff]  ;;  %v1986_v2 = vld [vmem:[%s1964_s11 + $0x8] sm:$0xff]  ;;  %v1768_v63 = vmov 0.0   ;;  %s2183_s26 = scalar_lea.vmem [#allocation8], %s1960_s12  ;;  %s2293_s25 = scalar_lea.vmem [#allocation10], %s1960_s12 }
  0x50   : > { %v1982_v1 = vld [vmem:[%s1972_s23] sm:$0xff]  ;;  %v1989_v3 = vld [vmem:[%s1972_s23 + $0x8] sm:$0xff]  ;;  %v1994_v4 = vld [vmem:[%s1972_s23 + $0x10] sm:$0xff]  ;;  %s2791_s9 = scalar_lea.vmem [#allocation7], %s1960_s12  ;;  %s847_s22 = sand.u32 1, %s1820_s19  }
  0x51   : > { %1421 = vrcp.f32 %v1982_v1  ;;  %v1998_v5 = vld [vmem:[%s1964_s11 + $0x10] sm:$0xff]  ;;  %v2003_v6 = vld [vmem:[%s1972_s23 + $0x18] sm:$0xff]  ;;  %v2009_v8 = vld [vmem:[%s1972_s23 + $0x20] sm:$0xff]  ;;  %vm313_vm0 = vcmp.gt.f32.partialorder %v1979_v0, %v1982_v1  ;;  %vm314_vm3 = vcmp.gt.f32.partialorder %v1986_v2, %v1989_v3  ;;  %s2838_s8 = sshll.u32 %s1820_s19, 11  ;;  %s884_s6 = sshll.u32 %s2183_s26, 4  ;;  %s2854_s6 = int_to_ptr.vmem [resolvable:$true] %s884_s6 }
  0x52   : > { %1423 = vrcp.f32 %v1979_v0  ;;  %v2006_v7 = vld [vmem:[%s1964_s11 + $0x18] sm:$0xff]  ;;  %v2013_v9 = vld [vmem:[%s1964_s11 + $0x20] sm:$0xff]  ;;  %v2017_v10 = vld [vmem:[%s1972_s23 + $0x28] sm:$0xff]  ;;  %vm315_vm11 = vcmp.gt.f32.partialorder %v1998_v5, %v1994_v4  ;;  %s901_s7 = sshll.u32 %s2293_s25, 4  ;;  %s2852_s5 = scalar_lea.hbm %s2981_s3, %s2838_s8  ;;  %s2863_s7 = int_to_ptr.vmem [resolvable:$true] %s901_s7 }
  0x53   : > { %1425 = vrcp.f32 %v1989_v3  ;;  %v2021_v12 = vld [vmem:[%s1964_s11 + $0x28] sm:$0xff]  ;;  %v2026_v15 = vld [vmem:[%s1972_s23 + $0x30] sm:$0xff]  ;;  %v2069_v61 = vld [vmem:[%s1972_s23 + $0x38] sm:$0xff]  ;;  %vm316_vm13 = vcmp.gt.f32.partialorder %v2006_v7, %v2003_v6  ;;  %s2861_s30 = scalar_lea.hbm %s2982_s4, %s2838_s8  ;;  %s1638_s13 = scalar_lea.vmem %s2854_s6, 2048 }
  0x54   : > { %1427 = vrcp.f32 %v1986_v2  ;;  %v2063_v56 = vld [vmem:[%s1964_s11 + $0x30] sm:$0xff]  ;;  %p1639_p13 = scmp.ne.s32.totalorder %s2854_s6, %s1638_s13  ;;  %p3045_p1 = scmp.ne.s32.totalorder %s2988_s27, 0 }
  0x55   : > { %1429 = vrcp.f32 %v1994_v4 }
  0x56   : > { %1431 = vrcp.f32 %v1998_v5  ;;  %p1640_p12 = pnand %p1639_p13, %p3045_p1 }
  0x57   : > { %1433 = vrcp.f32 %v2003_v6 }
  0x58   : > { %1435 = vrcp.f32 %v2006_v7  ;;  %p1641_p7 = pneg %p1640_p12 }
  0x59   : > { %1437 = vrcp.f32 %v2009_v8 }
  0x5a   : > { %1439 = vrcp.f32 %v2013_v9 }
  0x5b   : > { %1441 = vrcp.f32 %v2017_v10 }
  0x5c   : > { %1443 = vrcp.f32 %v2021_v12 }
  0x5d   : > { %1445 = vrcp.f32 %v2026_v15 }
  0x5e   : > { %v1422_v11 = vpop.eup %1421 }
  0x5f   : > { %v1424_v13 = vpop.eup %1423  ;;  %v330_v14 = vmul.f32 %v1422_v11, %v1979_v0 }
  0x60   : > { %v1426_v16 = vpop.eup %1425  ;;  %v378_v17 = vmul.f32 %v1424_v13, %v1982_v1 }
  0x61   : > { %v1428_v18 = vpop.eup %1427  ;;  %v1099_v19 = vand.u32 2147483647, %v330_v14  ;;  %v1101_v20 = vcvt.f32.s32 %v330_v14  ;;  %v332_v21 = vmul.f32 %v1426_v16, %v1986_v2  ;;  %v1104_v27 = vand.u32 2147483648, %v330_v14 }
  0x62   : > { %v1227_v22 = vand.u32 2147483647, %v378_v17  ;;  %v1229_v23 = vcvt.f32.s32 %v378_v17  ;;  %v380_v24 = vmul.f32 %v1428_v18, %v1989_v3  ;;  %v1430_v25 = vpop.eup %1429  ;;  %v1232_v32 = vand.u32 2147483648, %v378_v17 }
  0x63   : > { %v1102_v26 = vcvt.s32.f32 %v1101_v20  ;;  %v1107_v28 = vand.u32 2147483647, %v332_v21  ;;  %v1109_v29 = vcvt.f32.s32 %v332_v21  ;;  %vm2036_vm1 = vcmp.lt.f32.partialorder %v1099_v19, 8388608.0  ;;  %v1432_v34 = vpop.eup %1431 }
  0x64   : > { %v1230_v31 = vcvt.s32.f32 %v1229_v23  ;;  %v1235_v33 = vand.u32 2147483647, %v380_v24  ;;  %v1112_v37 = vand.u32 2147483648, %v332_v21  ;;  %v1237_v38 = vcvt.f32.s32 %v380_v24  ;;  %v1434_v51 = vpop.eup %1433  ;;  %v2083_v23 = vld [vmem:[%s1964_s11 + $0x38] sm:$0xff] }
  0x65   : > { %v1103_v35 = vand.u32 2147483647, %v1102_v26  ;;  %v1110_v36 = vcvt.s32.f32 %v1109_v29  ;;  %vm2040_vm2 = vcmp.lt.f32.partialorder %v1227_v22, 8388608.0  ;;  %vm2046_vm4 = vcmp.lt.f32.partialorder %v1107_v28, 8388608.0  ;;  %v1436_v57 = vpop.eup %1435 }
  0x66   : > { %v1231_v40 = vand.u32 2147483647, %v1230_v31  ;;  %v334_v42 = vmul.f32 %v1430_v25, %v1998_v5  ;;  %v1238_v45 = vcvt.s32.f32 %v1237_v38  ;;  %v1240_v46 = vand.u32 2147483648, %v380_v24  ;;  %v1438_v62 = vpop.eup %1437 }
  0x67   : > { %v1105_v43 = vor.u32 %v1104_v27, %v1103_v35  ;;  %v1111_v44 = vand.u32 2147483647, %v1110_v36  ;;  %vm2051_vm5 = vcmp.lt.f32.partialorder %v1235_v33, 8388608.0  ;;  %v2056_v50 = vmul.f32 %v1432_v34, %v1994_v4  ;;  %v1440_v16 = vpop.eup %1439 }
  0x68   : > { %v1233_v47 = vor.u32 %v1232_v32, %v1231_v40  ;;  %v1117_v49 = vcvt.f32.s32 %v334_v42  ;;  %v1239_v54 = vand.u32 2147483647, %v1238_v45  ;;  %v1115_v55 = vand.u32 2147483647, %v334_v42  ;;  %v1442_v19 = vpop.eup %1441 }
  0x69   : > { %v2060_v52 = vsel %vm2036_vm1, %v1105_v43, %v330_v14  ;;  %v1113_v53 = vor.u32 %v1112_v37, %v1111_v44  ;;  %v1120_v60 = vand.u32 2147483648, %v334_v42  ;;  %v1243_v18 = vand.u32 2147483647, %v2056_v50 }
  0x6a   : > { %v1234_v58 = vsel %vm2040_vm2, %v1233_v47, %v378_v17  ;;  %vm473_vm6 = vcmp.eq.f32.partialorder %v2060_v52, 1.0  ;;  %v1118_v59 = vcvt.s32.f32 %v1117_v49  ;;  %v1241_v14 = vor.u32 %v1240_v46, %v1239_v54 }
  0x6b   : > { %1447 = vrcp.f32 %v1234_v58  ;;  %v489_v11 = vsel %vm473_vm6, 1.0, %v1768_v63  ;;  %v2074_v13 = vsel %vm2046_vm4, %v1113_v53, %v332_v21  ;;  %vm1116_vm8 = vcmp.lt.f32.partialorder %v1115_v55, 8388608.0  ;;  %v2086_v21 = vpop.eup %1443 }
  0x6c   : > { %vm474_vm7 = vcmp.eq.f32.partialorder %v2074_v13, 1.0  ;;  %v1119_v17 = vand.u32 2147483647, %v1118_v59  ;;  %1449 = vrcp.f32 %v2063_v56  ;;  %v1242_v20 = vsel %vm2051_vm5, %v1241_v14, %v380_v24  ;;  %v2092_v28 = vpop.eup %1445 }
  0x6d   : > { %v1245_v22 = vcvt.f32.s32 %v2056_v50  ;;  %1451 = vrcp.f32 %v2069_v61  ;;  %v505_v25 = vsel %vm313_vm0, %v489_v11, %v1234_v58  ;;  %v490_v26 = vsel %vm474_vm7, 1.0, %v1768_v63 }
  0x6e   : > { %1453 = vrcp.f32 %v1242_v20  ;;  %v1121_v27 = vor.u32 %v1120_v60, %v1119_v17  ;;  %v1248_v29 = vand.u32 2147483648, %v2056_v50  ;;  %v336_v30 = vmul.f32 %v1434_v51, %v2006_v7 }
  0x6f   : > { %v1246_v24 = vcvt.s32.f32 %v1245_v22  ;;  %v384_v31 = vmul.f32 %v1436_v57, %v2003_v6  ;;  %vm2099_vm9 = vcmp.lt.f32.partialorder %v1243_v18, 8388608.0  ;;  %v2104_v34 = vmul.f32 %v1438_v62, %v2013_v9 }
  0x70   : > { %v2097_v32 = vsel %vm1116_vm8, %v1121_v27, %v334_v42  ;;  %1455 = vrcp.f32 %v2083_v23  ;;  %vm521_vm10 = vcmp.le.f32.partialorder %v505_v25, 8.0  ;;  %v2110_v35 = vsel %vm314_vm3, %v490_v26, %v1242_v20 }
  0x71   : > { %v1247_v36 = vand.u32 2147483647, %v1246_v24  ;;  %v1125_v37 = vcvt.f32.s32 %v336_v30  ;;  %vm475_vm12 = vcmp.eq.f32.partialorder %v2097_v32, 1.0  ;;  %v1123_v38 = vand.u32 2147483647, %v336_v30 }
  0x72   : > { %v1253_v39 = vcvt.f32.s32 %v384_v31  ;;  %v2116_v40 = vmul.f32 %v1440_v16, %v2009_v8  ;;  %v1128_v43 = vand.u32 2147483648, %v336_v30  ;;  %v1251_v44 = vand.u32 2147483647, %v384_v31 }
  0x73   : > { %v1249_v41 = vor.u32 %v1248_v29, %v1247_v36  ;;  %v1126_v42 = vcvt.s32.f32 %v1125_v37  ;;  %v1256_v46 = vand.u32 2147483648, %v384_v31  ;;  %v1131_v47 = vand.u32 2147483647, %v2104_v34 }
  0x74   : > { %v1254_v45 = vcvt.s32.f32 %v1253_v39  ;;  %v1133_v48 = vcvt.f32.s32 %v2104_v34  ;;  %vm522_vm14 = vcmp.le.f32.partialorder %v2110_v35, 8.0  ;;  %v2127_v53 = vmul.f32 %v1442_v19, %v2021_v12 }
  0x75   : > { %v1250_v49 = vsel %vm2099_vm9, %v1249_v41, %v2056_v50  ;;  %v1127_v51 = vand.u32 2147483647, %v1126_v42  ;;  %v491_v54 = vsel %vm475_vm12, 1.0, %v1768_v63  ;;  %vm1124_vm15 = vcmp.lt.f32.partialorder %v1123_v38, 8388608.0 }
  0x76   : > { %1457 = vrcp.f32 %v1250_v49  ;;  %v1255_v55 = vand.u32 2147483647, %v1254_v45  ;;  %vm2132_vm1 = vcmp.lt.f32.partialorder %v1251_v44, 8388608.0  ;;  %v1134_v59 = vcvt.s32.f32 %v1133_v48 }
  0x77   : > { %v1129_v57 = vor.u32 %v1128_v43, %v1127_v51  ;;  %v1136_v60 = vand.u32 2147483648, %v2104_v34  ;;  %vm2137_vm2 = vcmp.lt.f32.partialorder %v1131_v47, 8388608.0  ;;  %v1259_v14 = vand.u32 2147483647, %v2116_v40 }
  0x78   : > { %v1448_v50 = vpop.eup %1447  ;;  %v1257_v62 = vor.u32 %v1256_v46, %v1255_v55  ;;  %v1261_v16 = vcvt.f32.s32 %v2116_v40  ;;  %v1135_v20 = vand.u32 2147483647, %v1134_v59  ;;  %v1141_v22 = vcvt.f32.s32 %v2127_v53 }
  0x79   : > { %v2143_v17 = vpop.eup %1449  ;;  %v2149_v18 = vsel %vm313_vm0, %v2060_v52, %v1448_v50  ;;  %v2151_v19 = vsel %vm1124_vm15, %v1129_v57, %v336_v30  ;;  %vm317_vm7 = vcmp.gt.f32.partialorder %v2013_v9, %v2009_v8  ;;  %v1264_v30 = vand.u32 2147483648, %v2116_v40 }
  0x7a   : > { %v2154_v26 = vpop.eup %1451  ;;  %vm537_vm4 = vcmp.le.f32.partialorder %v2149_v18, 8.0  ;;  %vm569_vm5 = vcmp.gt.f32.partialorder %v2149_v18, 0.0  ;;  %v1258_v27 = vsel %vm2132_vm1, %v1257_v62, %v384_v31  ;;  %vm476_vm6 = vcmp.eq.f32.partialorder %v2151_v19, 1.0  ;;  %v2225_v62 = vld [vmem:[%s1972_s23 + $0x40] sm:$0xff]  ;;  %826 = vst [vmem:[%s2293_s25] sm:$0xff] %v2149_v18 }
  0x7b   : > { %v1454_v24 = vpop.eup %1453  ;;  %vm553_vm0 = vmand %vm521_vm10, %vm537_vm4  ;;  %1459 = vrcp.f32 %v1258_v27  ;;  %v1137_v52 = vor.u32 %v1136_v60, %v1135_v20  ;;  %v1262_v29 = vcvt.s32.f32 %v1261_v16  ;;  %v492_v33 = vsel %vm476_vm6, 1.0, %v1768_v63 }
  0x7c   : > { %vm585_vm8 = vmand %vm553_vm0, %vm569_vm5  ;;  %v2169_v31 = vsel %vm314_vm3, %v2074_v13, %v1454_v24  ;;  %v1139_v25 = vand.u32 2147483647, %v2127_v53  ;;  %v1142_v36 = vcvt.s32.f32 %v1141_v22  ;;  %v507_v39 = vsel %vm315_vm11, %v491_v54, %v1250_v49 }
  0x7d   : > { %v2173_v37 = vpop.eup %1455  ;;  %v601_v38 = vsel %vm585_vm8, %v2149_v18, 1.0  ;;  %vm538_vm9 = vcmp.le.f32.partialorder %v2169_v31, 8.0  ;;  %vm570_vm10 = vcmp.gt.f32.partialorder %v2169_v31, 0.0  ;;  %v2191_v41 = vsel %vm2137_vm2, %v1137_v52, %v2104_v34  ;;  %827 = vst [vmem:[%s2293_s25 + $0x8] sm:$0xff] %v2169_v31 }
  0x7e   : > { %v682_v13 = vmul.f32 %v601_v38, %v1982_v1  ;;  %810 = vst [vmem:[%s2183_s26] sm:$0xff] %v601_v38  ;;  %vm554_vm3 = vmand %vm522_vm14, %vm538_vm9  ;;  %v1263_v42 = vand.u32 2147483647, %v1262_v29  ;;  %v1143_v43 = vand.u32 2147483647, %v1142_v36  ;;  %v508_v1 = vsel %vm316_vm13, %v492_v33, %v1258_v27 }
  0x7f   : > { %vm586_vm12 = vmand %vm554_vm3, %vm570_vm10  ;;  %vm1260_vm15 = vcmp.lt.f32.partialorder %v1259_v14, 8388608.0  ;;  %v1144_v44 = vand.u32 2147483648, %v2127_v53  ;;  %v388_v35 = vmul.f32 %v2086_v21, %v2017_v10  ;;  %vm477_vm14 = vcmp.eq.f32.partialorder %v2191_v41, 1.0 }
  0x80   : > { %v602_v45 = vsel %vm586_vm12, %v2169_v31, 1.0  ;;  %v1265_v46 = vor.u32 %v1264_v30, %v1263_v42  ;;  %vm2201_vm1 = vcmp.lt.f32.partialorder %v1139_v25, 8388608.0  ;;  %v698_v47 = vadd.f32 0.025, %v682_v13 }
  0x81   : > { %v683_v48 = vmul.f32 %v602_v45, %v1989_v3  ;;  %811 = vst [vmem:[%s2183_s26 + $0x8] sm:$0xff] %v602_v45  ;;  %v1145_v49 = vor.u32 %v1144_v44, %v1143_v43  ;;  %v1269_v51 = vcvt.f32.s32 %v388_v35  ;;  %vm523_vm2 = vcmp.le.f32.partialorder %v507_v39, 8.0 }
  0x82   : > { %v1266_v54 = vsel %vm1260_vm15, %v1265_v46, %v2116_v40  ;;  %v1267_v21 = vand.u32 2147483647, %v388_v35  ;;  %v342_v55 = vmul.f32 %v2092_v28, %v2063_v56  ;;  %vm524_vm4 = vcmp.le.f32.partialorder %v508_v1, 8.0 }
  0x83   : > { %v1458_v57 = vpop.eup %1457  ;;  %v699_v58 = vadd.f32 0.025, %v683_v48  ;;  %1461 = vrcp.f32 %v1266_v54  ;;  %v493_v59 = vsel %vm477_vm14, 1.0, %v1768_v63  ;;  %v2220_v40 = vsel %vm2201_vm1, %v1145_v49, %v2127_v53 }
  0x84   : > { %v2215_v3 = vsel %vm315_vm11, %v2097_v32, %v1458_v57  ;;  %v1270_v60 = vcvt.s32.f32 %v1269_v51  ;;  %v1272_v50 = vand.u32 2147483648, %v388_v35  ;;  %1463 = vlog2.f32 %v698_v47 }
  0x85   : > { %vm539_vm5 = vcmp.le.f32.partialorder %v2215_v3, 8.0  ;;  %vm571_vm6 = vcmp.gt.f32.partialorder %v2215_v3, 0.0  ;;  %v1147_v28 = vand.u32 2147483647, %v342_v55  ;;  %v2231_v32 = vsel %vm317_vm7, %v493_v59, %v1266_v54  ;;  %828 = vst [vmem:[%s2293_s25 + $0x10] sm:$0xff] %v2215_v3 }
  0x86   : > { %vm555_vm0 = vmand %vm523_vm2, %vm539_vm5  ;;  %vm2233_vm11 = vcmp.lt.f32.partialorder %v1267_v21, 8388608.0  ;;  %v1271_v11 = vand.u32 2147483647, %v1270_v60  ;;  %v1149_v14 = vcvt.f32.s32 %v342_v55  ;;  %1465 = vlog2.f32 %v699_v58  ;;  %v2290_v58 = vld [vmem:[%s1964_s11 + $0x40] sm:$0xff]  ;;  %v2305_v60 = vld [vmem:[%s1972_s23 + $0x48] sm:$0xff] }
  0x87   : > { %vm587_vm8 = vmand %vm555_vm0, %vm571_vm6  ;;  %vm478_vm9 = vcmp.eq.f32.partialorder %v2220_v40, 1.0  ;;  %v1152_v16 = vand.u32 2147483648, %v342_v55  ;;  %v390_v20 = vmul.f32 %v2143_v17, %v2026_v15  ;;  %1467 = vrcp.f32 %v2225_v62 }
  0x88   : > { %v1460_v22 = vpop.eup %1459  ;;  %v603_v27 = vsel %vm587_vm8, %v2215_v3, 1.0  ;;  %v1273_v24 = vor.u32 %v1272_v50, %v1271_v11  ;;  %v1150_v52 = vcvt.s32.f32 %v1149_v14  ;;  %vm318_vm10 = vcmp.gt.f32.partialorder %v2021_v12, %v2017_v10  ;;  %v2312_v50 = vld [vmem:[%s1964_s11 + $0x48] sm:$0xff] }
  0x89   : > { %v684_v29 = vmul.f32 %v603_v27, %v1994_v4  ;;  %812 = vst [vmem:[%s2183_s26 + $0x10] sm:$0xff] %v603_v27  ;;  %v460_v30 = vsel %vm316_vm13, %v2151_v19, %v1460_v22  ;;  %v1277_v33 = vcvt.f32.s32 %v390_v20  ;;  %v2252_v17 = vmul.f32 %v2154_v26, %v2083_v23  ;;  %v2332_v27 = vld [vmem:[%s1972_s23 + $0x50] sm:$0xff] }
  0x8a   : > { %vm540_vm3 = vcmp.le.f32.partialorder %v460_v30, 8.0  ;;  %vm572_vm12 = vcmp.gt.f32.partialorder %v460_v30, 0.0  ;;  %v1274_v25 = vsel %vm2233_vm11, %v1273_v24, %v388_v35  ;;  %v1151_v4 = vand.u32 2147483647, %v1150_v52  ;;  %829 = vst [vmem:[%s2293_s25 + $0x18] sm:$0xff] %v460_v30 }
  0x8b   : > { %v700_v36 = vadd.f32 0.025, %v684_v29  ;;  %vm556_vm15 = vmand %vm524_vm4, %vm540_vm3  ;;  %1469 = vrcp.f32 %v1274_v25  ;;  %vm1148_vm13 = vcmp.lt.f32.partialorder %v1147_v28, 8388608.0  ;;  %v1275_v19 = vand.u32 2147483647, %v390_v20 }
  0x8c   : > { %vm588_vm14 = vmand %vm556_vm15, %vm572_vm12  ;;  %v1153_v38 = vor.u32 %v1152_v16, %v1151_v4  ;;  %v1278_v39 = vcvt.s32.f32 %v1277_v33  ;;  %v1280_v13 = vand.u32 2147483648, %v390_v20  ;;  %v2259_v26 = vmul.f32 %v2173_v37, %v2069_v61 }
  0x8d   : > { %1471 = vlog2.f32 %v700_v36  ;;  %v604_v42 = vsel %vm588_vm14, %v460_v30, 1.0  ;;  %vm319_vm1 = vcmp.gt.f32.partialorder %v2063_v56, %v2026_v15  ;;  %v1155_v43 = vand.u32 2147483647, %v2252_v17  ;;  %v2344_v30 = vld [vmem:[%s1964_s11 + $0x50] sm:$0xff] }
  0x8e   : > { %v1157_v1 = vcvt.f32.s32 %v2252_v17  ;;  %v685_v44 = vmul.f32 %v604_v42, %v2003_v6  ;;  %813 = vst [vmem:[%s2183_s26 + $0x18] sm:$0xff] %v604_v42  ;;  %vm525_vm2 = vcmp.le.f32.partialorder %v2231_v32, 8.0  ;;  %v2268_v35 = vsel %vm1148_vm13, %v1153_v38, %v342_v55  ;;  %v2362_v42 = vld [vmem:[%s1972_s23 + $0x58] sm:$0xff]  ;;  %v2399_v55 = vld [vmem:[%s1964_s11 + $0x68] sm:$0xff] }
  0x8f   : > { %v1279_v37 = vand.u32 2147483647, %v1278_v39  ;;  %v494_v45 = vsel %vm478_vm9, 1.0, %v1768_v63  ;;  %vm2273_vm4 = vcmp.lt.f32.partialorder %v1275_v19, 8388608.0  ;;  %v1160_v47 = vand.u32 2147483648, %v2252_v17 }
  0x90   : > { %v1158_v34 = vcvt.s32.f32 %v1157_v1  ;;  %v1462_v6 = vpop.eup %1461  ;;  %v701_v48 = vadd.f32 0.025, %v685_v44  ;;  %v1283_v51 = vand.u32 2147483647, %v2259_v26  ;;  %v1285_v54 = vcvt.f32.s32 %v2259_v26  ;;  %v2376_v44 = vld [vmem:[%s1972_s23 + $0x60] sm:$0xff] }
  0x91   : > { %v1281_v49 = vor.u32 %v1280_v13, %v1279_v37  ;;  %v461_v21 = vsel %vm317_vm7, %v2191_v41, %v1462_v6  ;;  %vm479_vm5 = vcmp.eq.f32.partialorder %v2268_v35, 1.0  ;;  %vm2285_vm6 = vcmp.lt.f32.partialorder %v1155_v43, 8388608.0  ;;  %v1464_v41 = vpop.eup %1463  ;;  %v2368_v43 = vld [vmem:[%s1964_s11 + $0x58] sm:$0xff] }
  0x92   : > { %v1159_v57 = vand.u32 2147483647, %v1158_v34  ;;  %1473 = vlog2.f32 %v701_v48  ;;  %vm541_vm7 = vcmp.le.f32.partialorder %v461_v21, 8.0  ;;  %vm573_vm0 = vcmp.gt.f32.partialorder %v461_v21, 0.0  ;;  %830 = vst [vmem:[%s2293_s25 + $0x20] sm:$0xff] %v461_v21 }
  0x93   : > { %v1282_v59 = vsel %vm2273_vm4, %v1281_v49, %v390_v20  ;;  %vm557_vm11 = vmand %vm525_vm2, %vm541_vm7  ;;  %v1286_v31 = vcvt.s32.f32 %v1285_v54  ;;  %v1288_v3 = vand.u32 2147483648, %v2259_v26  ;;  %v1466_v28 = vpop.eup %1465  ;;  %v510_v53 = vsel %vm318_vm10, %v494_v45, %v1274_v25 }
  0x94   : > { %1475 = vrcp.f32 %v1282_v59  ;;  %v1161_v18 = vor.u32 %v1160_v47, %v1159_v57  ;;  %vm589_vm8 = vmand %vm557_vm11, %vm573_vm0  ;;  %v495_v32 = vsel %vm479_vm5, 1.0, %v1768_v63  ;;  %vm2320_vm9 = vcmp.lt.f32.partialorder %v1283_v51, 8388608.0  ;;  %v1468_v14 = vpop.eup %1467  ;;  %v2383_v47 = vld [vmem:[%s1964_s11 + $0x60] sm:$0xff] }
  0x95   : > { %1477 = vrcp.f32 %v2290_v58  ;;  %v605_v16 = vsel %vm589_vm8, %v461_v21, 1.0  ;;  %v1287_v22 = vand.u32 2147483647, %v1286_v31  ;;  %v2338_v52 = vmul.f32 %v1468_v14, %v2290_v58 }
  0x96   : > { %v2328_v20 = vsel %vm2285_vm6, %v1161_v18, %v2252_v17  ;;  %1479 = vrcp.f32 %v2305_v60  ;;  %v686_v24 = vmul.f32 %v605_v16, %v2009_v8  ;;  %814 = vst [vmem:[%s2183_s26 + $0x20] sm:$0xff] %v605_v16  ;;  %vm526_vm12 = vcmp.le.f32.partialorder %v510_v53, 8.0 }
  0x97   : > { %vm480_vm3 = vcmp.eq.f32.partialorder %v2328_v20, 1.0  ;;  %1481 = vrcp.f32 %v2312_v50  ;;  %vm320_vm15 = vcmp.gt.f32.partialorder %v2083_v23, %v2069_v61  ;;  %v1289_v29 = vor.u32 %v1288_v3, %v1287_v22 }
  0x98   : > { %v1470_v33 = vpop.eup %1469  ;;  %v702_v17 = vadd.f32 0.025, %v686_v24  ;;  %v511_v8 = vsel %vm319_vm1, %v495_v32, %v1282_v59  ;;  %v1165_v25 = vcvt.f32.s32 %v2338_v52  ;;  %1483 = vrcp.f32 %v2332_v27  ;;  %v2440_v24 = vld [vmem:[%s1972_s23 + $0x70] sm:$0xff] }
  0x99   : > { %v462_v4 = vsel %vm318_vm10, %v2220_v40, %v1470_v33  ;;  %v1290_v36 = vsel %vm2320_vm9, %v1289_v29, %v2259_v26  ;;  %v496_v19 = vsel %vm480_vm3, 1.0, %v1768_v63  ;;  %v715_v38 = vmul.f32 0.6931472, %v1464_v41 }
  0x9a   : > { %v1472_v39 = vpop.eup %1471  ;;  %vm542_vm13 = vcmp.le.f32.partialorder %v462_v4, 8.0  ;;  %vm574_vm14 = vcmp.gt.f32.partialorder %v462_v4, 0.0  ;;  %v1163_v13 = vand.u32 2147483647, %v2338_v52  ;;  %1485 = vrcp.f32 %v2344_v30  ;;  %831 = vst [vmem:[%s2293_s25 + $0x28] sm:$0xff] %v462_v4 }
  0x9b   : > { %vm558_vm10 = vmand %vm526_vm12, %vm542_vm13  ;;  %vm527_vm2 = vcmp.le.f32.partialorder %v511_v8, 8.0  ;;  %1487 = vrcp.f32 %v1290_v36  ;;  %v1166_v40 = vcvt.s32.f32 %v1165_v25  ;;  %v1168_v26 = vand.u32 2147483648, %v2338_v52 }
  0x9c   : > { %1489 = vlog2.f32 %v702_v17  ;;  %vm590_vm4 = vmand %vm558_vm10, %vm574_vm14  ;;  %v2373_v1 = vsel %vm320_vm15, %v496_v19, %v1290_v36  ;;  %v2379_v37 = vadd.f32 0.025, %v1979_v0  ;;  %v717_v45 = vmul.f32 0.6931472, %v1466_v28  ;;  %v2393_v0 = vld [vmem:[%s1972_s23 + $0x68] sm:$0xff] }
  0x9d   : > { %v606_v46 = vsel %vm590_vm4, %v462_v4, 1.0  ;;  %v1167_v34 = vand.u32 2147483647, %v1166_v40  ;;  %1491 = vrcp.f32 %v2362_v42  ;;  %v719_v6 = vmul.f32 0.6931472, %v1472_v39 }
  0x9e   : > { %v687_v48 = vmul.f32 %v606_v46, %v2017_v10  ;;  %815 = vst [vmem:[%s2183_s26 + $0x28] sm:$0xff] %v606_v46  ;;  %vm2387_vm5 = vcmp.lt.f32.partialorder %v1163_v13, 8388608.0  ;;  %1493 = vrcp.f32 %v2368_v43  ;;  %v2395_v51 = vmul.f32 1.442695, %v715_v38 }
  0x9f   : > { %v1474_v54 = vpop.eup %1473  ;;  %v1169_v21 = vor.u32 %v1168_v26, %v1167_v34  ;;  %1495 = vrcp.f32 %v2376_v44  ;;  %v2402_v57 = vadd.f32 0.025, %v1986_v2  ;;  %v2405_v10 = vadd.f32 0.025, %v1998_v5 }
  0xa0   : > { %v703_v59 = vadd.f32 0.025, %v687_v48  ;;  %vm528_vm6 = vcmp.le.f32.partialorder %v2373_v1, 8.0  ;;  %1497 = vrcp.f32 %v2383_v47  ;;  %v2409_v18 = vmul.f32 1.442695, %v717_v45 }
  0xa1   : > { %v1476_v41 = vpop.eup %1475  ;;  %v2412_v31 = vadd.f32 0.025, %v2006_v7  ;;  %1499 = vrcp.f32 %v2393_v0  ;;  %v2419_v5 = vmul.f32 1.442695, %v719_v6  ;;  %v2422_v28 = vadd.f32 0.025, %v2013_v9 }
  0xa2   : > { %v1478_v3 = vpop.eup %1477  ;;  %v463_v2 = vsel %vm319_vm1, %v2268_v35, %v1476_v41  ;;  %v2427_v7 = vsel %vm2387_vm5, %v1169_v21, %v2338_v52  ;;  %1501 = vrcp.f32 %v2399_v55  ;;  %v2434_v9 = vmul.f32 0.6931472, %v1474_v54 }
  0xa3   : > { %v1480_v53 = vpop.eup %1479  ;;  %vm543_vm7 = vcmp.le.f32.partialorder %v463_v2, 8.0  ;;  %vm575_vm0 = vcmp.gt.f32.partialorder %v463_v2, 0.0  ;;  %v394_v32 = vmul.f32 %v1478_v3, %v2225_v62  ;;  %832 = vst [vmem:[%s2293_s25 + $0x30] sm:$0xff] %v463_v2  ;;  %v2437_v14 = vadd.f32 0.025, %v2021_v12 }
  0xa4   : > { %v1482_v35 = vpop.eup %1481  ;;  %vm559_vm1 = vmand %vm527_vm2, %vm543_vm7  ;;  %v348_v11 = vmul.f32 %v1480_v53, %v2312_v50  ;;  %1503 = vlog2.f32 %v703_v59  ;;  %v2443_v52 = vadd.f32 0.025, %v2063_v56  ;;  %vm321_vm8 = vcmp.gt.f32.partialorder %v2290_v58, %v2225_v62 }
  0xa5   : > { %vm591_vm11 = vmand %vm559_vm1, %vm575_vm0  ;;  %v1291_v16 = vand.u32 2147483647, %v394_v32  ;;  %v1293_v22 = vcvt.f32.s32 %v394_v32  ;;  %v1484_v29 = vpop.eup %1483  ;;  %vm481_vm9 = vcmp.eq.f32.partialorder %v2427_v7, 1.0  ;;  %v1296_v4 = vand.u32 2147483648, %v394_v32 }
  0xa6   : > { %v607_v33 = vsel %vm591_vm11, %v463_v2, 1.0  ;;  %v1171_v17 = vand.u32 2147483647, %v348_v11  ;;  %v1173_v8 = vcvt.f32.s32 %v348_v11  ;;  %v2451_v36 = vmul.f32 %v1482_v35, %v2305_v60 }
  0xa7   : > { %v688_v12 = vmul.f32 %v607_v33, %v2026_v15  ;;  %816 = vst [vmem:[%s2183_s26 + $0x30] sm:$0xff] %v607_v33  ;;  %v1294_v25 = vcvt.s32.f32 %v1293_v22  ;;  %v1486_v19 = vpop.eup %1485  ;;  %vm2453_vm3 = vcmp.lt.f32.partialorder %v1291_v16, 8388608.0  ;;  %v1176_v39 = vand.u32 2147483648, %v348_v11 }
  0xa8   : > { %v1174_v38 = vcvt.s32.f32 %v1173_v8  ;;  %1505 = vrcp.f32 %v2440_v24  ;;  %v1488_v13 = vpop.eup %1487  ;;  %v1301_v15 = vcvt.f32.s32 %v2451_v36  ;;  %v2460_v45 = vmul.f32 %v1484_v29, %v2344_v30 }
  0xa9   : > { %v704_v40 = vadd.f32 0.025, %v688_v12  ;;  %v1295_v26 = vand.u32 2147483647, %v1294_v25  ;;  %v2462_v46 = vpop.eup %1489  ;;  %v464_v34 = vsel %vm320_vm15, %v2328_v20, %v1488_v13  ;;  %vm322_vm12 = vcmp.gt.f32.partialorder %v2312_v50, %v2305_v60 }
  0xaa   : > { %vm2470_vm13 = vcmp.lt.f32.partialorder %v1171_v17, 8388608.0  ;;  %v1175_v48 = vand.u32 2147483647, %v1174_v38  ;;  %v1299_v49 = vand.u32 2147483647, %v2451_v36  ;;  %v1492_v54 = vpop.eup %1491  ;;  %vm544_vm14 = vcmp.le.f32.partialorder %v464_v34, 8.0 }
  0xab   : > { %vm576_vm10 = vcmp.gt.f32.partialorder %v464_v34, 0.0  ;;  %v1297_v21 = vor.u32 %v1296_v4, %v1295_v26  ;;  %v1179_v41 = vand.u32 2147483647, %v2460_v45  ;;  %833 = vst [vmem:[%s2293_s25 + $0x38] sm:$0xff] %v464_v34  ;;  %v1494_v59 = vpop.eup %1493  ;;  %vm560_vm15 = vmand %vm528_vm6, %vm544_vm14  ;;  %v497_v23 = vsel %vm481_vm9, 1.0, %v1768_v63 }
  0xac   : > { %v1177_v20 = vor.u32 %v1176_v39, %v1175_v48  ;;  %v1302_v3 = vcvt.s32.f32 %v1301_v15  ;;  %v398_v2 = vmul.f32 %v1486_v19, %v2332_v27  ;;  %v1496_v53 = vpop.eup %1495  ;;  %1507 = vlog2.f32 %v704_v40  ;;  %vm592_vm2 = vmand %vm560_vm15, %vm576_vm10 }
  0xad   : > { %v1298_v35 = vsel %vm2453_vm3, %v1297_v21, %v394_v32  ;;  %v1304_v16 = vand.u32 2147483648, %v2451_v36  ;;  %v1181_v1 = vcvt.f32.s32 %v2460_v45  ;;  %v2487_v22 = vpop.eup %1497  ;;  %v608_v29 = vsel %vm592_vm2, %v464_v34, 1.0 }
  0xae   : > { %1509 = vrcp.f32 %v1298_v35  ;;  %v2491_v33 = vsel %vm2470_vm13, %v1177_v20, %v348_v11  ;;  %vm2493_vm4 = vcmp.lt.f32.partialorder %v1299_v49, 8388608.0  ;;  %v2497_v8 = vpop.eup %1499  ;;  %v689_v32 = vmul.f32 %v608_v29, %v2069_v61  ;;  %817 = vst [vmem:[%s2183_s26 + $0x38] sm:$0xff] %v608_v29 }
  0xaf   : > { %v1303_v12 = vand.u32 2147483647, %v1302_v3  ;;  %vm482_vm5 = vcmp.eq.f32.partialorder %v2491_v33, 1.0  ;;  %vm2502_vm6 = vcmp.lt.f32.partialorder %v1179_v41, 8388608.0  ;;  %vm323_vm7 = vcmp.gt.f32.partialorder %v2344_v30, %v2332_v27  ;;  %v2509_v38 = vpop.eup %1501 }
  0xb0   : > { %v1182_v11 = vcvt.s32.f32 %v1181_v1  ;;  %v1184_v4 = vand.u32 2147483648, %v2460_v45  ;;  %v1307_v19 = vand.u32 2147483647, %v398_v2  ;;  %v1309_v56 = vcvt.f32.s32 %v398_v2 }
  0xb1   : > { %v513_v61 = vsel %vm321_vm8, %v497_v23, %v1298_v35  ;;  %v1305_v39 = vor.u32 %v1304_v16, %v1303_v12  ;;  %v498_v13 = vsel %vm482_vm5, 1.0, %v1768_v63  ;;  %v352_v40 = vmul.f32 %v1492_v54, %v2368_v43  ;;  %v2516_v26 = vpop.eup %1503 }
  0xb2   : > { %v1183_v15 = vand.u32 2147483647, %v1182_v11  ;;  %v1310_v34 = vcvt.s32.f32 %v1309_v56  ;;  %v1312_v6 = vand.u32 2147483648, %v398_v2  ;;  %v400_v48 = vmul.f32 %v1494_v59, %v2362_v42 }
  0xb3   : > { %v705_v49 = vadd.f32 0.025, %v689_v32  ;;  %v1306_v21 = vsel %vm2493_vm4, %v1305_v39, %v2451_v36  ;;  %v1187_v41 = vand.u32 2147483647, %v352_v40  ;;  %v1189_v20 = vcvt.f32.s32 %v352_v40 }
  0xb4   : > { %1511 = vrcp.f32 %v1306_v21  ;;  %v1185_v23 = vor.u32 %v1184_v4, %v1183_v15  ;;  %vm2522_vm0 = vcmp.lt.f32.partialorder %v1307_v19, 8388608.0  ;;  %v1311_v54 = vand.u32 2147483647, %v1310_v34 }
  0xb5   : > { %v2526_v35 = vpop.eup %1505  ;;  %v2531_v59 = vsel %vm322_vm12, %v498_v13, %v1306_v21  ;;  %v1190_v16 = vcvt.s32.f32 %v1189_v20  ;;  %v1192_v1 = vand.u32 2147483648, %v352_v40  ;;  %v354_v36 = vmul.f32 %v1496_v53, %v2383_v47 }
  0xb6   : > { %v2537_v29 = vsel %vm2502_vm6, %v1185_v23, %v2460_v45  ;;  %v1313_v17 = vor.u32 %v1312_v6, %v1311_v54  ;;  %vm324_vm1 = vcmp.gt.f32.partialorder %v2368_v43, %v2362_v42  ;;  %v1315_v32 = vand.u32 2147483647, %v400_v48 }
  0xb7   : > { %v1317_v12 = vcvt.f32.s32 %v400_v48  ;;  %1513 = vlog2.f32 %v705_v49  ;;  %vm483_vm11 = vcmp.eq.f32.partialorder %v2537_v29, 1.0  ;;  %vm2542_vm9 = vcmp.lt.f32.partialorder %v1187_v41, 8388608.0 }
  0xb8   : > { %v1191_v4 = vand.u32 2147483647, %v1190_v16  ;;  %v1314_v53 = vsel %vm2522_vm0, %v1313_v17, %v398_v2  ;;  %v499_v45 = vsel %vm483_vm11, 1.0, %v1768_v63  ;;  %v1320_v19 = vand.u32 2147483648, %v400_v48 }
  0xb9   : > { %v1318_v25 = vcvt.s32.f32 %v1317_v12  ;;  %vm529_vm3 = vcmp.le.f32.partialorder %v513_v61, 8.0  ;;  %vm530_vm13 = vcmp.le.f32.partialorder %v2531_v59, 8.0  ;;  %1515 = vrcp.f32 %v1314_v53  ;;  %v2550_v39 = vpop.eup %1507 }
  0xba   : > { %v1193_v56 = vor.u32 %v1192_v1, %v1191_v4  ;;  %vm2552_vm14 = vcmp.lt.f32.partialorder %v1315_v32, 8388608.0  ;;  %v1195_v34 = vand.u32 2147483647, %v354_v36  ;;  %v1197_v6 = vcvt.f32.s32 %v354_v36 }
  0xbb   : > { %v1319_v15 = vand.u32 2147483647, %v1318_v25  ;;  %v1510_v2 = vpop.eup %1509  ;;  %v2559_v49 = vsel %vm323_vm7, %v499_v45, %v1314_v53  ;;  %v1200_v41 = vand.u32 2147483648, %v354_v36  ;;  %v402_v20 = vmul.f32 %v2487_v22, %v2376_v44 }
  0xbc   : > { %v2563_v21 = vsel %vm2542_vm9, %v1193_v56, %v352_v40  ;;  %v465_v23 = vsel %vm321_vm8, %v2427_v7, %v1510_v2  ;;  %v1198_v54 = vcvt.s32.f32 %v1197_v6  ;;  %v2575_v40 = vmul.f32 %v2497_v8, %v2399_v55 }
  0xbd   : > { %v1321_v3 = vor.u32 %v1320_v19, %v1319_v15  ;;  %vm484_vm10 = vcmp.eq.f32.partialorder %v2563_v21, 1.0  ;;  %vm545_vm15 = vcmp.le.f32.partialorder %v465_v23, 8.0  ;;  %vm577_vm2 = vcmp.gt.f32.partialorder %v465_v23, 0.0  ;;  %834 = vst [vmem:[%s2293_s25 + $0x40] sm:$0xff] %v465_v23 }
  0xbe   : > { %v500_v16 = vsel %vm484_vm10, 1.0, %v1768_v63  ;;  %vm561_vm4 = vmand %vm529_vm3, %vm545_vm15  ;;  %v1199_v7 = vand.u32 2147483647, %v1198_v54  ;;  %v1323_v1 = vand.u32 2147483647, %v402_v20  ;;  %v1325_v17 = vcvt.f32.s32 %v402_v20 }
  0xbf   : > { %v1322_v22 = vsel %vm2552_vm14, %v1321_v3, %v400_v48  ;;  %vm593_vm8 = vmand %vm561_vm4, %vm577_vm2  ;;  %vm531_vm5 = vcmp.le.f32.partialorder %v2559_v49, 8.0  ;;  %vm325_vm6 = vcmp.gt.f32.partialorder %v2383_v47, %v2376_v44  ;;  %vm1196_vm0 = vcmp.lt.f32.partialorder %v1195_v34, 8388608.0 }
  0xc0   : > { %1517 = vrcp.f32 %v1322_v22  ;;  %v1203_v8 = vand.u32 2147483647, %v2575_v40  ;;  %v609_v32 = vsel %vm593_vm8, %v465_v23, 1.0  ;;  %v1201_v61 = vor.u32 %v1200_v41, %v1199_v7 }
  0xc1   : > { %v1326_v12 = vcvt.s32.f32 %v1325_v17  ;;  %v1328_v11 = vand.u32 2147483648, %v402_v20  ;;  %v1512_v48 = vpop.eup %1511  ;;  %v690_v4 = vmul.f32 %v609_v32, %v2225_v62  ;;  %818 = vst [vmem:[%s2183_s26 + $0x40] sm:$0xff] %v609_v32  ;;  %v2590_v53 = vsel %vm324_vm1, %v500_v16, %v1322_v22  ;;  %v2640_v17 = vld [vmem:[%s1972_s23 + $0x78] sm:$0xff]  ;;  %s1769_s23 = smov [#allocation8]  }
  0xc2   : > { %v1205_v45 = vcvt.f32.s32 %v2575_v40  ;;  %v2595_v25 = vmul.f32 %v2509_v38, %v2393_v0  ;;  %v466_v19 = vsel %vm322_vm12, %v2491_v33, %v1512_v48  ;;  %v2601_v56 = vsel %vm1196_vm0, %v1201_v61, %v354_v36  ;;  %v2612_v38 = vld [vmem:[%s1964_s11 + $0x70] sm:$0xff] }
  0xc3   : > { %vm2603_vm11 = vcmp.lt.f32.partialorder %v1323_v1, 8388608.0  ;;  %v1327_v13 = vand.u32 2147483647, %v1326_v12  ;;  %v706_v15 = vadd.f32 0.025, %v690_v4  ;;  %vm546_vm9 = vcmp.le.f32.partialorder %v466_v19, 8.0 }
  0xc4   : > { %vm578_vm3 = vcmp.gt.f32.partialorder %v466_v19, 0.0  ;;  %vm2607_vm14 = vcmp.lt.f32.partialorder %v1203_v8, 8388608.0  ;;  %835 = vst [vmem:[%s2293_s25 + $0x48] sm:$0xff] %v466_v19  ;;  %v2615_v6 = vpop.eup %1513  ;;  %vm562_vm12 = vmand %vm530_vm13, %vm546_vm9  ;;  %vm485_vm10 = vcmp.eq.f32.partialorder %v2601_v56, 1.0  ;;  %v1206_v36 = vcvt.s32.f32 %v1205_v45 }
  0xc5   : > { %v1329_v33 = vor.u32 %v1328_v11, %v1327_v13  ;;  %v1208_v2 = vand.u32 2147483648, %v2575_v40  ;;  %1519 = vlog2.f32 %v706_v15  ;;  %vm594_vm15 = vmand %vm562_vm12, %vm578_vm3  ;;  %v1331_v41 = vand.u32 2147483647, %v2595_v25  ;;  %v2665_v11 = vld [vmem:[%s1964_s11 + $0x78] sm:$0xff] }
  0xc6   : > { %v1333_v23 = vcvt.f32.s32 %v2595_v25  ;;  %v2625_v3 = vmul.f32 %v2526_v35, %v2612_v38  ;;  %v1516_v59 = vpop.eup %1515  ;;  %v610_v54 = vsel %vm594_vm15, %v466_v19, 1.0  ;;  %v1207_v22 = vand.u32 2147483647, %v1206_v36 }
  0xc7   : > { %v1330_v16 = vsel %vm2603_vm11, %v1329_v33, %v402_v20  ;;  %1521 = vrcp.f32 %v2612_v38  ;;  %v691_v7 = vmul.f32 %v610_v54, %v2305_v60  ;;  %819 = vst [vmem:[%s2183_s26 + $0x48] sm:$0xff] %v610_v54  ;;  %v467_v1 = vsel %vm323_vm7, %v2537_v29, %v1516_v59 }
  0xc8   : > { %1523 = vrcp.f32 %v1330_v16  ;;  %v501_v35 = vsel %vm485_vm10, 1.0, %v1768_v63  ;;  %vm547_vm13 = vcmp.le.f32.partialorder %v467_v1, 8.0  ;;  %vm579_vm2 = vcmp.gt.f32.partialorder %v467_v1, 0.0  ;;  %836 = vst [vmem:[%s2293_s25 + $0x50] sm:$0xff] %v467_v1 }
  0xc9   : > { %vm532_vm4 = vcmp.le.f32.partialorder %v2590_v53, 8.0  ;;  %vm326_vm8 = vcmp.gt.f32.partialorder %v2399_v55, %v2393_v0  ;;  %v1209_v60 = vor.u32 %v1208_v2, %v1207_v22  ;;  %v707_v20 = vadd.f32 0.025, %v691_v7  ;;  %vm563_vm7 = vmand %vm531_vm5, %vm547_vm13  ;;  %v1581_v22 = vld [vmem:[%s1964_s11 + $0x38] sm:$0xff]  ;;  %s2869_s11 = scalar_lea.sflag [#allocation9], %s847_s22 }
  0xca   : > { %v1334_v29 = vcvt.s32.f32 %v1333_v23  ;;  %v1336_v8 = vand.u32 2147483648, %v2595_v25  ;;  %v1213_v32 = vcvt.f32.s32 %v2625_v3  ;;  %vm595_vm0 = vmand %vm563_vm7, %vm579_vm2  ;;  %v2653_v61 = vsel %vm325_vm6, %v501_v35, %v1330_v16 }
  0xcb   : > { %v2658_v12 = vsel %vm2607_vm14, %v1209_v60, %v2575_v40  ;;  %vm2660_vm11 = vcmp.lt.f32.partialorder %v1331_v41, 8388608.0  ;;  %1525 = vrcp.f32 %v2640_v17  ;;  %v611_v48 = vsel %vm595_vm0, %v467_v1, 1.0 }
  0xcc   : > { %1527 = vlog2.f32 %v707_v20  ;;  %v1335_v4 = vand.u32 2147483647, %v1334_v29  ;;  %v1211_v45 = vand.u32 2147483647, %v2625_v3  ;;  %v692_v62 = vmul.f32 %v611_v48, %v2332_v27  ;;  %820 = vst [vmem:[%s2183_s26 + $0x50] sm:$0xff] %v611_v48 }
  0xcd   : > { %v1518_v19 = vpop.eup %1517  ;;  %v1214_v40 = vcvt.s32.f32 %v1213_v32  ;;  %v1216_v13 = vand.u32 2147483648, %v2625_v3  ;;  %v723_v15 = vmul.f32 0.6931472, %v2462_v46  ;;  %vm486_vm5 = vcmp.eq.f32.partialorder %v2658_v12, 1.0 }
  0xce   : > { %v468_v34 = vsel %vm324_vm1, %v2563_v21, %v1518_v19  ;;  %v1337_v33 = vor.u32 %v1336_v8, %v1335_v4  ;;  %1529 = vrcp.f32 %v2665_v11  ;;  %v708_v36 = vadd.f32 0.025, %v692_v62 }
  0xcf   : > { %vm548_vm9 = vcmp.le.f32.partialorder %v468_v34, 8.0  ;;  %vm580_vm3 = vcmp.gt.f32.partialorder %v468_v34, 0.0  ;;  %v1215_v27 = vand.u32 2147483647, %v1214_v40  ;;  %837 = vst [vmem:[%s2293_s25 + $0x58] sm:$0xff] %v468_v34  ;;  %vm1212_vm12 = vcmp.lt.f32.partialorder %v1211_v45, 8388608.0 }
  0xd0   : > { %vm564_vm14 = vmand %vm532_vm4, %vm548_vm9  ;;  %v1338_v46 = vsel %vm2660_vm11, %v1337_v33, %v2595_v25  ;;  %1531 = vlog2.f32 %v2379_v37  ;;  %v725_v21 = vmul.f32 0.6931472, %v2516_v26  ;;  %v502_v2 = vsel %vm486_vm5, 1.0, %v1768_v63 }
  0xd1   : > { %1533 = vlog2.f32 %v708_v36  ;;  %vm596_vm1 = vmand %vm564_vm14, %vm580_vm3  ;;  %v1217_v41 = vor.u32 %v1216_v13, %v1215_v27  ;;  %v2689_v23 = vmul.f32 1.442695, %v2434_v9  ;;  %vm533_vm10 = vcmp.le.f32.partialorder %v2653_v61, 8.0 }
  0xd2   : > { %v612_v53 = vsel %vm596_vm1, %v468_v34, 1.0  ;;  %1535 = vrcp.f32 %v1338_v46  ;;  %v727_v25 = vmul.f32 0.6931472, %v2550_v39  ;;  %v1520_v59 = vpop.eup %1519  ;;  %v2699_v54 = vmul.f32 1.442695, %v723_v15 }
  0xd3   : > { %v693_v37 = vmul.f32 %v612_v53, %v2362_v42  ;;  %821 = vst [vmem:[%s2183_s26 + $0x58] sm:$0xff] %v612_v53  ;;  %v2696_v26 = vsel %vm1212_vm12, %v1217_v41, %v2625_v3  ;;  %1537 = vlog2.f32 %v2402_v57  ;;  %v2704_v9 = vsel %vm326_vm8, %v502_v2, %v1338_v46 }
  0xd4   : > { %v1522_v16 = vpop.eup %1521  ;;  %1539 = vlog2.f32 %v2405_v10  ;;  %v2707_v39 = vmul.f32 1.442695, %v725_v21  ;;  %v624_v42 = vadd.f32 0.025, %v1581_v22  ;;  %vm487_vm15 = vcmp.eq.f32.partialorder %v2696_v26, 1.0 }
  0xd5   : > { %v1524_v7 = vpop.eup %1523  ;;  %v406_v3 = vmul.f32 %v1522_v16, %v2440_v24  ;;  %1541 = vlog2.f32 %v2412_v31  ;;  %v729_v57 = vmul.f32 0.6931472, %v2615_v6  ;;  %v2714_v1 = vadd.f32 0.025, %v693_v37 }
  0xd6   : > { %v469_v10 = vsel %vm325_vm6, %v2601_v56, %v1524_v7  ;;  %v2720_v35 = vmul.f32 1.442695, %v727_v25  ;;  %v625_v60 = vadd.f32 0.025, %v2290_v58  ;;  %vm534_vm4 = vcmp.le.f32.partialorder %v2704_v9, 8.0 }
  0xd7   : > { %vm549_vm13 = vcmp.le.f32.partialorder %v469_v10, 8.0  ;;  %vm581_vm2 = vcmp.gt.f32.partialorder %v469_v10, 0.0  ;;  %vm327_vm7 = vcmp.gt.f32.partialorder %v2612_v38, %v2440_v24  ;;  %1543 = vlog2.f32 %v2422_v28  ;;  %838 = vst [vmem:[%s2293_s25 + $0x60] sm:$0xff] %v469_v10 }
  0xd8   : > { %v731_v31 = vmul.f32 0.6931472, %v1520_v59  ;;  %v1526_v6 = vpop.eup %1525  ;;  %vm565_vm0 = vmand %vm533_vm10, %vm549_vm13  ;;  %v1339_v56 = vand.u32 2147483647, %v406_v3  ;;  %v1341_v20 = vcvt.f32.s32 %v406_v3  ;;  %v503_v58 = vsel %vm487_vm15, 1.0, %v1768_v63 }
  0xd9   : > { %1545 = vlog2.f32 %v2437_v14  ;;  %v1528_v29 = vpop.eup %1527  ;;  %vm597_vm6 = vmand %vm565_vm0, %vm581_vm2  ;;  %v360_v8 = vmul.f32 %v1526_v6, %v2665_v11  ;;  %v2736_v28 = vmul.f32 1.442695, %v729_v57  ;;  %v626_v32 = vadd.f32 0.025, %v2312_v50 }
  0xda   : > { %1547 = vlog2.f32 %v2443_v52  ;;  %v613_v61 = vsel %vm597_vm6, %v469_v10, 1.0  ;;  %v1342_v49 = vcvt.s32.f32 %v1341_v20  ;;  %v1344_v48 = vand.u32 2147483648, %v406_v3 }
  0xdb   : > { %v733_v4 = vmul.f32 0.6931472, %v1528_v29  ;;  %v1530_v45 = vpop.eup %1529  ;;  %822 = vst [vmem:[%s2183_s26 + $0x60] sm:$0xff] %v613_v61  ;;  %v1219_v19 = vand.u32 2147483647, %v360_v8  ;;  %v1221_v62 = vcvt.f32.s32 %v360_v8  ;;  %1549 = vlog2.f32 %v624_v42 }
  0xdc   : > { %v2740_v14 = vmul.f32 1.442695, %v731_v31  ;;  %vm2742_vm11 = vcmp.lt.f32.partialorder %v1339_v56, 8388608.0  ;;  %v1343_v52 = vand.u32 2147483647, %v1342_v49  ;;  %v408_v13 = vmul.f32 %v1530_v45, %v2640_v17 }
  0xdd   : > { %1551 = vlog2.f32 %v625_v60  ;;  %v1532_v50 = vpop.eup %1531  ;;  %v1222_v15 = vcvt.s32.f32 %v1221_v62  ;;  %v1224_v34 = vand.u32 2147483648, %v360_v8  ;;  %v2747_v33 = vmul.f32 1.442695, %v733_v4 }
  0xde   : > { %1553 = vlog2.f32 %v626_v32  ;;  %v2749_v36 = vpop.eup %1533  ;;  %v1345_v27 = vor.u32 %v1344_v48, %v1343_v52  ;;  %vm2751_vm5 = vcmp.lt.f32.partialorder %v1219_v19, 8388608.0  ;;  %v1347_v21 = vand.u32 2147483647, %v408_v13 }
  0xdf   : > { %v1349_v2 = vcvt.f32.s32 %v408_v13  ;;  %v1536_v41 = vpop.eup %1535  ;;  %v694_v53 = vmul.f32 %v613_v61, %v2376_v44  ;;  %v1223_v25 = vand.u32 2147483647, %v1222_v15  ;;  %v634_v59 = vmul.f32 0.6931472, %v1532_v50 }
  0xe0   : > { %v627_v37 = vadd.f32 0.025, %v2344_v30  ;;  %v1538_v16 = vpop.eup %1537  ;;  %v470_v22 = vsel %vm326_vm8, %v2658_v12, %v1536_v41  ;;  %v1346_v42 = vsel %vm2742_vm11, %v1345_v27, %v406_v3  ;;  %vm328_vm9 = vcmp.gt.f32.partialorder %v2665_v11, %v2640_v17 }
  0xe1   : > { %v1350_v7 = vcvt.s32.f32 %v1349_v2  ;;  %v1352_v57 = vand.u32 2147483648, %v408_v13  ;;  %v1540_v10 = vpop.eup %1539  ;;  %vm550_vm3 = vcmp.le.f32.partialorder %v470_v22, 8.0  ;;  %vm582_vm14 = vcmp.gt.f32.partialorder %v470_v22, 0.0  ;;  %839 = vst [vmem:[%s2293_s25 + $0x68] sm:$0xff] %v470_v22 }
  0xe2   : > { %1555 = vrcp.f32 %v1346_v42  ;;  %vm2765_vm12 = vcmp.lt.f32.partialorder %v1347_v21, 8388608.0  ;;  %v1542_v44 = vpop.eup %1541  ;;  %vm566_vm8 = vmand %vm534_vm4, %vm550_vm3  ;;  %v2775_v12 = vsel %vm327_vm7, %v503_v58, %v1346_v42  ;;  %v1225_v3 = vor.u32 %v1224_v34, %v1223_v25 }
  0xe3   : > { %v1351_v60 = vand.u32 2147483647, %v1350_v7  ;;  %v666_v31 = vmul.f32 1.442695, %v634_v59  ;;  %vm598_vm1 = vmand %vm566_vm8, %vm582_vm14  ;;  %v636_v6 = vmul.f32 0.6931472, %v1538_v16  ;;  %1557 = vlog2.f32 %v627_v37 }
  0xe4   : > { %v638_v56 = vmul.f32 0.6931472, %v1540_v10  ;;  %v640_v20 = vmul.f32 0.6931472, %v1542_v44  ;;  %v1544_v29 = vpop.eup %1543  ;;  %v614_v32 = vsel %vm598_vm1, %v470_v22, 1.0  ;;  %v2779_v9 = vsel %vm2751_vm5, %v1225_v3, %v360_v8 }
  0xe5   : > { %v1353_v61 = vor.u32 %v1352_v57, %v1351_v60  ;;  %v762_v49 = vsub.f32 %v666_v31, %v2395_v51  ;;  %v695_v48 = vmul.f32 %v614_v32, %v2393_v0  ;;  %823 = vst [vmem:[%s2183_s26 + $0x68] sm:$0xff] %v614_v32  ;;  %vm488_vm10 = vcmp.eq.f32.partialorder %v2779_v9, 1.0 }
  0xe6   : > { %v1546_v58 = vpop.eup %1545  ;;  %v667_v4 = vmul.f32 1.442695, %v636_v6  ;;  %v668_v45 = vmul.f32 1.442695, %v638_v56  ;;  %v710_v62 = vadd.f32 0.025, %v694_v53 }
  0xe7   : > { %v1548_v19 = vpop.eup %1547  ;;  %v1354_v40 = vsel %vm2765_vm12, %v1353_v61, %v408_v13  ;;  %v778_v52 = vand.u32 2147483647, %v762_v49  ;;  %v669_v8 = vmul.f32 1.442695, %v640_v20  ;;  %vm535_vm15 = vcmp.le.f32.partialorder %v2775_v12, 8.0 }
  0xe8   : > { %1559 = vrcp.f32 %v1354_v40  ;;  %v504_v51 = vsel %vm488_vm10, 1.0, %v1768_v63  ;;  %v763_v0 = vsub.f32 %v667_v4, %v2409_v18  ;;  %v1550_v50 = vpop.eup %1549  ;;  %v711_v15 = vadd.f32 0.025, %v695_v48 }
  0xe9   : > { %794 = vst [vmem:[%s2791_s9] sm:$0xff] %v778_v52  ;;  %v764_v34 = vsub.f32 %v668_v45, %v2419_v5  ;;  %v765_v13 = vsub.f32 %v669_v8, %v2689_v23  ;;  %v642_v27 = vmul.f32 0.6931472, %v1544_v29  ;;  %1561 = vlog2.f32 %v2714_v1 }
  0xea   : > { %v1552_v46 = vpop.eup %1551  ;;  %v779_v63 = vand.u32 2147483647, %v763_v0  ;;  %v644_v21 = vmul.f32 0.6931472, %v1546_v58  ;;  %v646_v18 = vmul.f32 0.6931472, %v1548_v19  ;;  %1563 = vlog2.f32 %v710_v62 }
  0xeb   : > { %v1554_v2 = vpop.eup %1553  ;;  %v780_v41 = vand.u32 2147483647, %v764_v34  ;;  %v781_v53 = vand.u32 2147483647, %v765_v13  ;;  %v670_v25 = vmul.f32 1.442695, %v642_v27  ;;  %v2800_v5 = vsel %vm328_vm9, %v504_v51, %v1354_v40 }
  0xec   : > { %795 = vst [vmem:[%s2791_s9 + $0x8] sm:$0xff] %v779_v63  ;;  %v671_v23 = vmul.f32 1.442695, %v644_v21  ;;  %v672_v59 = vmul.f32 1.442695, %v646_v18  ;;  %1565 = vlog2.f32 %v711_v15  ;;  %vm536_vm0 = vcmp.le.f32.partialorder %v2800_v5, 8.0 }
  0xed   : > { %v648_v37 = vmul.f32 0.6931472, %v1550_v50  ;;  %796 = vst [vmem:[%s2791_s9 + $0x10] sm:$0xff] %v780_v41  ;;  %797 = vst [vmem:[%s2791_s9 + $0x18] sm:$0xff] %v781_v53  ;;  %v766_v1 = vsub.f32 %v670_v25, %v2699_v54  ;;  %v650_v16 = vmul.f32 0.6931472, %v1552_v46 }
  0xee   : > { %v652_v22 = vmul.f32 0.6931472, %v1554_v2  ;;  %v735_v42 = vmul.f32 0.6931472, %v2749_v36  ;;  %v767_v7 = vsub.f32 %v671_v23, %v2707_v39  ;;  %v768_v57 = vsub.f32 %v672_v59, %v2720_v35 }
  0xef   : > { %v673_v10 = vmul.f32 1.442695, %v648_v37  ;;  %v628_v30 = vadd.f32 0.025, %v2368_v43  ;;  %v1556_v44 = vpop.eup %1555  ;;  %v782_v3 = vand.u32 2147483647, %v766_v1 }
  0xf0   : > { %v674_v60 = vmul.f32 1.442695, %v650_v16  ;;  %v675_v54 = vmul.f32 1.442695, %v652_v22  ;;  %v471_v36 = vsel %vm327_vm7, %v2696_v26, %v1556_v44  ;;  %v783_v39 = vand.u32 2147483647, %v767_v7  ;;  %v1558_v6 = vpop.eup %1557 }
  0xf1   : > { %v784_v31 = vand.u32 2147483647, %v768_v57  ;;  %v769_v35 = vsub.f32 %v673_v10, %v2736_v28  ;;  %vm551_vm13 = vcmp.le.f32.partialorder %v471_v36, 8.0  ;;  %vm583_vm2 = vcmp.gt.f32.partialorder %v471_v36, 0.0  ;;  %798 = vst [vmem:[%s2791_s9 + $0x20] sm:$0xff] %v782_v3  ;;  %840 = vst [vmem:[%s2293_s25 + $0x70] sm:$0xff] %v471_v36 }
  0xf2   : > { %v770_v43 = vsub.f32 %v674_v60, %v2740_v14  ;;  %v771_v56 = vsub.f32 %v675_v54, %v2747_v33  ;;  %vm567_vm4 = vmand %vm535_vm15, %vm551_vm13  ;;  %799 = vst [vmem:[%s2791_s9 + $0x28] sm:$0xff] %v783_v39  ;;  %v654_v28 = vmul.f32 0.6931472, %v1558_v6  ;;  %v756_v20 = vmul.f32 1.442695, %v735_v42 }
  0xf3   : > { %800 = vst [vmem:[%s2791_s9 + $0x30] sm:$0xff] %v784_v31  ;;  %v785_v26 = vand.u32 2147483647, %v769_v35  ;;  %1567 = vlog2.f32 %v628_v30  ;;  %vm599_vm7 = vmand %vm567_vm4, %vm583_vm2  ;;  %v629_v12 = vadd.f32 0.025, %v2383_v47 }
  0xf4   : > { %v786_v29 = vand.u32 2147483647, %v770_v43  ;;  %v787_v32 = vand.u32 2147483647, %v771_v56  ;;  %v615_v14 = vsel %vm599_vm7, %v471_v36, 1.0 }
  0xf5   : > { %801 = vst [vmem:[%s2791_s9 + $0x38] sm:$0xff] %v785_v26  ;;  %v676_v33 = vmul.f32 1.442695, %v654_v28  ;;  %v1560_v61 = vpop.eup %1559  ;;  %v696_v49 = vmul.f32 %v615_v14, %v2440_v24  ;;  %824 = vst [vmem:[%s2183_s26 + $0x70] sm:$0xff] %v615_v14  ;;  %v630_v58 = vadd.f32 0.025, %v2399_v55  ;;  %1569 = vlog2.f32 %v629_v12 }
  0xf6   : > { %802 = vst [vmem:[%s2791_s9 + $0x40] sm:$0xff] %v786_v29  ;;  %803 = vst [vmem:[%s2791_s9 + $0x48] sm:$0xff] %v787_v32  ;;  %v472_v48 = vsel %vm328_vm9, %v2779_v9, %v1560_v61  ;;  %v631_v47 = vadd.f32 0.025, %v2612_v38  ;;  %v1562_v24 = vpop.eup %1561  ;;  %v632_v38 = vadd.f32 0.025, %v2665_v11 }
  0xf7   : > { %v772_v4 = vsub.f32 %v676_v33, %v756_v20  ;;  %v712_v45 = vadd.f32 0.025, %v696_v49  ;;  %vm552_vm6 = vcmp.le.f32.partialorder %v472_v48, 8.0  ;;  %vm584_vm11 = vcmp.gt.f32.partialorder %v472_v48, 0.0  ;;  %841 = vst [vmem:[%s2293_s25 + $0x78] sm:$0xff] %v472_v48  ;;  %v2843_v55 = vpop.eup %1563  ;;  %s1642_s25 = sshll.u32 %s1769_s23, 4  ;;  %s1643_s25 = int_to_ptr.vmem [resolvable:$false] %s1642_s25 }
  0xf8   : > { %vm568_vm5 = vmand %vm536_vm0, %vm552_vm6  ;;  %1571 = vlog2.f32 %v630_v58  ;;  %v737_v40 = vmul.f32 0.6931472, %v1562_v24  ;;  %s1644_s29 = scalar_lea.vmem %s1643_s25, 4096  ;;  %p1645_p10 = scmp.lt.s32.totalorder %s2854_s6, %s1643_s25 }
  0xf9   : > { %v788_v9 = vand.u32 2147483647, %v772_v4  ;;  %1573 = vlog2.f32 %v712_v45  ;;  %vm600_vm9 = vmand %vm568_vm5, %vm584_vm11  ;;  %v1566_v62 = vpop.eup %1565  ;;  %p1646_p0 = scmp.lt.s32.totalorder %s1644_s29, %s1638_s13 }
  0xfa   : > { %v616_v19 = vsel %vm600_vm9, %v472_v48, 1.0  ;;  %1575 = vlog2.f32 %v631_v47 }
  0xfb   : > { %804 = vst [vmem:[%s2791_s9 + $0x50] sm:$0xff] %v788_v9  ;;  %v697_v11 = vmul.f32 %v616_v19, %v2640_v17  ;;  %825 = vst [vmem:[%s2183_s26 + $0x78] sm:$0xff] %v616_v19  ;;  %1577 = vlog2.f32 %v632_v38  ;;  %p1647_p2 = por %p1646_p0, %p1645_p10 }
  0xfd   : > { %p1648_p4 = pnand %p1647_p2, %p1641_p7 }
  0xff   : > { %1651 = shalt.err (!%p1648_p4)
}
 0x100   : > { %s1652_s19 = scalar_lea.hbm %s2852_s5, 2048  ;;  %s1656_s20 = scalar_lea.hbm %s2981_s3, 4096 }
 0x101   : > { %p1653_p9 = scmp.ne.s32.totalorder %s2852_s5, %s1652_s19  ;;  %p1657_p5 = scmp.lt.s32.totalorder %s2852_s5, %s2981_s3 }
 0x102   : > { %p1658_p8 = scmp.lt.s32.totalorder %s1656_s20, %s1652_s19 }
 0x103   : > { %p1654_p11 = pnand %p1653_p9, %p3045_p1 }
 0x104   : > { %p1659_p6 = por %p1658_p8, %p1657_p5 }
 0x105   : > { %p1655_p3 = pneg %p1654_p11 }
 0x107   : > { %p1660_p13 = pnand %p1659_p6, %p1655_p3 }
 0x109   : > { %1663 = shalt.err (!%p1660_p13)
}
 0x10a   : > { %s1770_s13 = smov 1024   ;;  %s1771_s23 = smov 64   ;;  %v713_v17 = vadd.f32 0.025, %v697_v11 }
 0x10b   : > { %1360 = dma.vmem_to_hbm [thread:$0]  (%p3045_p1), %s2854_s6, 2048, %s2852_s5, %s2869_s11, %s1770_s13, %s1770_s13, %s1771_s23  }
 0x10c   : > { %s1664_s25 = scalar_lea.vmem %s2863_s7, 2048  ;;  %s1772_s29 = smov [#allocation10]  }
 0x10d   : > { %p1665_p12 = scmp.ne.s32.totalorder %s2863_s7, %s1664_s25  ;;  %s1668_s19 = sshll.u32 %s1772_s29, 4  ;;  %s1669_s19 = int_to_ptr.vmem [resolvable:$false] %s1668_s19 }
 0x10e   : > { %s1670_s26 = scalar_lea.vmem %s1669_s19, 4096  ;;  %p1671_p0 = scmp.lt.s32.totalorder %s2863_s7, %s1669_s19 }
 0x10f   : > { %p1666_p7 = pnand %p1665_p12, %p3045_p1  ;;  %p1672_p2 = scmp.lt.s32.totalorder %s1670_s26, %s1664_s25 }
 0x111   : > { %p1667_p10 = pneg %p1666_p7  ;;  %p1673_p4 = por %p1672_p2, %p1671_p0 }
 0x113   : > { %p1674_p9 = pnand %p1673_p4, %p1667_p10 }
 0x115   : > { %1677 = shalt.err (!%p1674_p9)
}
 0x116   : > { %s1678_s6 = scalar_lea.hbm %s2861_s30, 2048  ;;  %s1682_s20 = scalar_lea.hbm %s2982_s4, 4096 }
 0x117   : > { %p1679_p11 = scmp.ne.s32.totalorder %s2861_s30, %s1678_s6  ;;  %p1683_p8 = scmp.lt.s32.totalorder %s2861_s30, %s2982_s4 }
 0x118   : > { %p1684_p6 = scmp.lt.s32.totalorder %s1682_s20, %s1678_s6 }
 0x119   : > { %p1680_p3 = pnand %p1679_p11, %p3045_p1 }
 0x11a   : > { %p1685_p13 = por %p1684_p6, %p1683_p8 }
 0x11b   : > { %p1681_p5 = pneg %p1680_p3 }
 0x11d   : > { %p1686_p12 = pnand %p1685_p13, %p1681_p5 }
 0x11f   : > { %1689 = shalt.err (!%p1686_p12)
}
 0x120   : > { %1361 = dma.vmem_to_hbm [thread:$0]  (%p3045_p1), %s2863_s7, 2048, %s2861_s30, %s2869_s11, %s1770_s13, %s1770_s13, %s1771_s23   ;;  %v1568_v52 = vpop.eup %1567  ;;  %1579 = vlog2.f32 %v713_v17  ;;  %v757_v51 = vmul.f32 1.442695, %v737_v40  ;;  %v739_v0 = vmul.f32 0.6931472, %v2843_v55 }
 0x121   : > { %v656_v8 = vmul.f32 0.6931472, %v1568_v52  ;;  %v741_v50 = vmul.f32 0.6931472, %v1566_v62  ;;  %v1570_v34 = vpop.eup %1569  ;;  %s867_s7 = sshll.u32 %s2791_s9, 4  ;;  %s2929_s25 = scalar_lea.hbm %s2980_s2, %s2838_s8  ;;  %s2931_s7 = int_to_ptr.vmem [resolvable:$true] %s867_s7 }
 0x122   : > { %v658_v27 = vmul.f32 0.6931472, %v1570_v34  ;;  %v758_v46 = vmul.f32 1.442695, %v739_v0  ;;  %v1572_v63 = vpop.eup %1571  ;;  %s843_s29 = scalar_lea.sflag [#allocation4], %s1957_s10  ;;  %s1690_s19 = scalar_lea.vmem %s2931_s7, 2048 }
 0x123   : > { %v677_v15 = vmul.f32 1.442695, %v656_v8  ;;  %v759_v21 = vmul.f32 1.442695, %v741_v50  ;;  %v1574_v18 = vpop.eup %1573  ;;  %v660_v53 = vmul.f32 0.6931472, %v1572_v63  ;;  %p1691_p7 = scmp.ne.s32.totalorder %s2931_s7, %s1690_s19 }
 0x124   : > { %v678_v41 = vmul.f32 1.442695, %v658_v27  ;;  %v1576_v25 = vpop.eup %1575  ;;  %v743_v5 = vmul.f32 0.6931472, %v1574_v18  ;;  %s1773_s26 = smov [#allocation7]  }
 0x125   : > { %v773_v13 = vsub.f32 %v677_v15, %v757_v51  ;;  %v1578_v23 = vpop.eup %1577  ;;  %v679_v37 = vmul.f32 1.442695, %v660_v53  ;;  %v662_v1 = vmul.f32 0.6931472, %v1576_v25  ;;  %p1692_p10 = pnand %p1691_p7, %p3045_p1  ;;  %s1694_s6 = sshll.u32 %s1773_s26, 4  ;;  %s1695_s6 = int_to_ptr.vmem [resolvable:$false] %s1694_s6 }
 0x126   : > { %v774_v59 = vsub.f32 %v678_v41, %v758_v46  ;;  %v760_v16 = vmul.f32 1.442695, %v743_v5  ;;  %v664_v22 = vmul.f32 0.6931472, %v1578_v23  ;;  %s1696_s5 = scalar_lea.vmem %s1695_s6, 4096  ;;  %p1697_p2 = scmp.lt.s32.totalorder %s2931_s7, %s1695_s6 }
 0x127   : > { %v789_v2 = vand.u32 2147483647, %v773_v13  ;;  %v775_v7 = vsub.f32 %v679_v37, %v759_v21  ;;  %v680_v57 = vmul.f32 1.442695, %v662_v1  ;;  %p1693_p0 = pneg %p1692_p10  ;;  %p1698_p4 = scmp.lt.s32.totalorder %s1696_s5, %s1690_s19 }
 0x128   : > { %v790_v42 = vand.u32 2147483647, %v774_v59  ;;  %v681_v3 = vmul.f32 1.442695, %v664_v22 }
 0x129   : > { %805 = vst [vmem:[%s2791_s9 + $0x58] sm:$0xff] %v789_v2  ;;  %v791_v30 = vand.u32 2147483647, %v775_v7  ;;  %v776_v44 = vsub.f32 %v680_v57, %v760_v16  ;;  %p1699_p9 = por %p1698_p4, %p1697_p2 }
 0x12a   : > { %806 = vst [vmem:[%s2791_s9 + $0x60] sm:$0xff] %v790_v42 }
 0x12b   : > { %807 = vst [vmem:[%s2791_s9 + $0x68] sm:$0xff] %v791_v30  ;;  %v792_v54 = vand.u32 2147483647, %v776_v44  ;;  %p1700_p11 = pnand %p1699_p9, %p1693_p0 }
 0x12d   : > { %v1580_v10 = vpop.eup %1579  ;;  %808 = vst [vmem:[%s2791_s9 + $0x70] sm:$0xff] %v792_v54 }
 0x12e   : > { %v745_v60 = vmul.f32 0.6931472, %v1580_v10 }
 0x130   : > { %v761_v36 = vmul.f32 1.442695, %v745_v60 }
 0x132   : > { %v777_v39 = vsub.f32 %v681_v3, %v761_v36 }
 0x134   : > { %v793_v31 = vand.u32 2147483647, %v777_v39 }
 0x136   : > { %809 = vst [vmem:[%s2791_s9 + $0x78] sm:$0xff] %v793_v31 }
 0x137   : > { %1703 = shalt.err (!%p1700_p11)
}
 0x138   : > { %s1704_s9 = scalar_lea.hbm %s2929_s25, 2048  ;;  %s1708_s22 = scalar_lea.hbm %s2980_s2, 4096 }
 0x139   : > { %p1705_p3 = scmp.ne.s32.totalorder %s2929_s25, %s1704_s9  ;;  %p1709_p6 = scmp.lt.s32.totalorder %s2929_s25, %s2980_s2 }
 0x13a   : > { %p1710_p13 = scmp.lt.s32.totalorder %s1708_s22, %s1704_s9 }
 0x13b   : > { %p1706_p5 = pnand %p1705_p3, %p3045_p1 }
 0x13c   : > { %p1711_p12 = por %p1710_p13, %p1709_p6 }
 0x13d   : > { %p1707_p8 = pneg %p1706_p5 }
 0x13f   : > { %p1712_p7 = pnand %p1711_p12, %p1707_p8 }
 0x141   : > { %1715 = shalt.err (!%p1712_p7)
}
 0x142   : > { %1359 = dma.vmem_to_hbm [thread:$0]  (%p3045_p1), %s2931_s7, 2048, %s2929_s25, %s843_s29, %s1770_s13, %s1770_s13, %s1771_s23  }
 0x143 PF: > { %s916_s12 = sand.u32 1, %s1750_s15   ;;  %p3046_p10 = scmp.ne.s32.totalorder %s2989_s28, 0 }
 0x144   : > { %p3047_p0 = scmp.ge.s32.totalorder %s1762_s18, 2  ;;  %s917_s30 = scalar_lea.sflag [#allocation4], %s916_s12 }
 0x146   : > { %p1373_p2 = pnand %p3047_p0, %p3046_p10 }
 0x148   : > { %p1374_p4 = pneg %p1373_p2 }
 0x14a   : > { %1741 = dma.done.wait (%p1374_p4), %s917_s30, 2048  }
 0x14b   : > { %1743 = vsyncadd (%p1374_p4), %s917_s30, 4294965248  ;;  %s3048_s27 = sadd.s32 4294967294, %s1762_s18  }
 0x14c   : > { %s925_s11 = sand.u32 1, %s3048_s27  }
 0x14d   : > { %s926_s19 = scalar_lea.sflag [#allocation9], %s925_s11 }
 0x14e   : > { %1745 = dma.done.wait (%p1374_p4), %s926_s19, 4096  }
 0x14f   : > { %1747 = vsyncadd (%p1374_p4), %s926_s19, 4294963200  ;;  %p24_p1 = scmp.ge.s32.totalorder %s1824_s21, 4   ;;  %s3049_s15 = smov %s1754_s16 }
 0x150   : > { %s3050_s16 = smov %s1758_s17  ;;  %s3051_s17 = smov %s1836_s24 }
 0x151   : > { %s3052_s18 = smov %s1824_s21  ;;  %26 = sbr.rel (!%p24_p1) target bundleno = 9 (0x9), region = 118 }
 0x156   :  { %940 = vsyncpa [#allocation3], 1 }
 0x157   :  { %942 = vsyncpa [#allocation3 + $0x1], 1 }
 0x158   :  { %943 = vsyncpa [#allocation6], 1 }
 0x159   :  { %945 = vsyncpa [#allocation6 + $0x1], 1 }
 0x15a   :  { %946 = vsyncpa [#allocation4], 1 }
 0x15b   :  { %948 = vsyncpa [#allocation4 + $0x1], 1 }
 0x15c   :  { %949 = vsyncpa [#allocation9], 1 }
 0x15d   :  { %951 = vsyncpa [#allocation9 + $0x1], 1 }

</bundles_post_ra>
